<compile_context>
chip_gen: v7x
topology: tpu7x:2x2x1
jax: 0.10.0
libtpu: 0.0.40
codegen_flags: <defaults>
</compile_context>

<pallas_src>
import jax
import jax.numpy as jnp
from jax import lax
from jax.experimental import pallas as pl
from jax.experimental.pallas import tpu as pltpu


def _light_conv_kernel(x_ref, w1_ref, b1_ref, wdw_ref, b2_ref, lab_ref, o_ref):
    """One grid step == one (image, Cout-tile) pair. NHWC layout.

    x_ref   : (1, H, W, Cin)   input tile
    w1_ref  : (Cin, TC)        1x1-conv weight with BN1 scale folded in
    b1_ref  : (1, TC)          folded conv1+BN1 bias
    wdw_ref : (K, K, TC)       depthwise weights with BN2 scale folded in
    b2_ref  : (1, TC)          folded conv2+BN2 bias
    lab_ref : (2,) in SMEM     [lab_scale, lab_bias]
    o_ref   : (1, H, W, TC)    output tile
    """
    _, H, W, Cin = x_ref.shape
    TC = o_ref.shape[3]
    K = wdw_ref.shape[0]
    p = (K - 1) // 2

    # ---------------- stage 1: 1x1 conv (+ folded BN1 affine) ----------------
    # MXU matmul, f32 accumulation. With W % 8 == 0 the (H,W,Cin)->(H*W,Cin)
    # reshape is layout-free; for other W Mosaic inserts a relayout (correct,
    # slightly slower).
    x2d = x_ref[0].reshape(H * W, Cin)
    y = jnp.dot(x2d, w1_ref[...], preferred_element_type=jnp.float32)
    y = (y + b1_ref[...]).reshape(H, W, TC)                # (H, W, TC) f32

    # -------- stage 2: depthwise KxK conv, SAME padding, stride 1 ------------
    # Intermediate stays in values. H (outer dim) is zero-padded once; the
    # W-axis masked roll is computed ONCE PER dx on the padded tensor (hoisted
    # out of the dy loop), then the dy loop only slices + mul-adds.
    zrow = jnp.zeros((p, W, TC), jnp.float32)
    yh = jnp.concatenate([zrow, y, zrow], axis=0)          # (H + 2p, W, TC)

    wall = wdw_ref[...].astype(jnp.float32)                # hoisted (K, K, TC)
    widx = lax.broadcasted_iota(jnp.int32, (1, W, 1), 1)

    shifted = []                                           # per-dx lane-shifted yh
    for dx in range(K):
        d = dx - p
        if d == 0:
            shifted.append(yh)
        else:
            valid = jnp.logical_and(widx + d >= 0, widx + d < W)
            rolled = pltpu.roll(yh, shift=(-d) % W, axis=1)   # XLU, free-ish slot
            shifted.append(jnp.where(valid, rolled, 0.0))

    # Accumulator seeded with folded conv2+BN2 bias (no memset, no extra add).
    acc = jnp.broadcast_to(b2_ref[...], (H, W, TC)).astype(jnp.float32)
    for dy in range(K):                                    # static, unrolled
        for dx in range(K):
            acc = acc + shifted[dx][dy:dy + H] * wall[dy, dx]

    z = jnp.maximum(acc, 0.0)                              # ReLU
    z = lab_ref[0] * z + lab_ref[1]                        # LearnableAffineBlock
    o_ref[0] = z.astype(o_ref.dtype)


def light_conv_bn_act(x_nchw, params, *, eps=1e-5):
    """Fused LightConvBNAct forward. x_nchw: (N, Cin, H, W)."""
    N, Cin, H, W = x_nchw.shape
    w1 = params["conv1_w"]            # (Cout, Cin, 1, 1)
    cb1 = params["conv1_b"]           # (Cout,)
    g1, b1, m1, v1 = (params["bn1_gamma"], params["bn1_beta"],
                      params["bn1_mean"], params["bn1_var"])
    wdw = params["conv2_w"]           # (Cout, 1, K, K) depthwise
    cb2 = params["conv2_b"]           # (Cout,)
    g2, b2, m2, v2 = (params["bn2_gamma"], params["bn2_beta"],
                      params["bn2_mean"], params["bn2_var"])
    lab = jnp.stack([params["lab_scale"][0],
                     params["lab_bias"][0]]).astype(jnp.float32)

    Cout = w1.shape[0]
    K = wdw.shape[2]
    assert K % 2 == 1, "SAME-padding path assumes odd kernel size (HGNet: 3/5)"

    # Fold BN (eval mode) *scales* into the conv weights; keep biases separate
    # (they cannot be folded through the zero padding of the depthwise conv).
    s1 = g1 / jnp.sqrt(v1 + eps)
    w1_mat = (jnp.transpose(w1[:, :, 0, 0], (1, 0)) * s1[None, :]).astype(x_nchw.dtype)
    b1f = ((b1 + (cb1 - m1) * s1)[None, :]).astype(jnp.float32)            # (1, Cout)
    s2 = g2 / jnp.sqrt(v2 + eps)
    wdw_hwc = (jnp.transpose(wdw[:, 0], (1, 2, 0)) * s2[None, None, :]).astype(jnp.float32)
    b2f = ((b2 + (cb2 - m2) * s2)[None, :]).astype(jnp.float32)            # (1, Cout)

    # Pad Cout to a multiple of 128: lane-dense output stores (no vst.msk) and
    # no whole-Cout fallback block. Padded channels are sliced off at the end.
    Cout_pad = -(-Cout // 128) * 128
    if Cout_pad != Cout:
        pad = Cout_pad - Cout
        w1_mat = jnp.pad(w1_mat, ((0, 0), (0, pad)))
        b1f = jnp.pad(b1f, ((0, 0), (0, pad)))
        wdw_hwc = jnp.pad(wdw_hwc, ((0, 0), (0, 0), (0, pad)))
        b2f = jnp.pad(b2f, ((0, 0), (0, pad)))

    # Hardware query (fallback = conservative v7x numbers).
    try:
        vmem_cap = int(getattr(pltpu.get_tpu_info(), "vmem_capacity_bytes", 64 << 20))
    except Exception:  # pragma: no cover - non-TPU trace environments
        vmem_cap = 64 << 20

    itemsize = jnp.dtype(x_nchw.dtype).itemsize
    sub = {4: 8, 2: 16, 1: 32}.get(itemsize, 8)
    p = (K - 1) // 2

    def est_vmem(tc):
        """Per-step VMEM footprint, including lane/sublane layout padding."""
        w_p = -(-W // sub) * sub
        cin_lane = -(-Cin // 128) * 128
        in_b = 2 * H * w_p * cin_lane * itemsize              # double-buffered input
        out_b = 2 * H * w_p * tc * itemsize                   # double-buffered output
        wt_b = 2 * ((-(-Cin // 8) * 8) * tc + K * K * tc + 2 * tc) * 4
        # live f32 temporaries: yh + (K-1) shifted + acc + y ≈ (K+3) tensors
        mid_b = (K + 3) * (H + 2 * p) * (-(-W // 8) * 8) * tc * 4
        return in_b + out_b + wt_b + mid_b

    # Cout tile: 256 only where it divides Cout_pad AND VMEM is plentiful
    # (v5e/v6e 128 MiB); v7x (64 MiB) prefers 128 to bound f32 intermediates.
    TC = 256 if (Cout_pad % 256 == 0 and vmem_cap >= (100 << 20)) else 128
    if TC == 256 and est_vmem(256) > int(0.35 * vmem_cap):
        TC = 128
    n_ct = Cout_pad // TC
    est_bytes = est_vmem(TC)

    # TODO(synk): keep the surrounding model NHWC end-to-end to drop these.
    x_nhwc = jnp.transpose(x_nchw, (0, 2, 3, 1))

    # Shard the grid across TensorCores along N (the x block index is constant
    # across c, so sharding along c would duplicate input HBM traffic).
    sem = ("parallel", "arbitrary") if N >= 2 else ("parallel", "parallel")
    cp_kwargs = dict(dimension_semantics=sem)
    if est_bytes > (16 << 20):  # only raise past the smallest scoped default
        cp_kwargs["vmem_limit_bytes"] = int(
            min(max(int(est_bytes * 1.25), 32 << 20), int(0.72 * vmem_cap)))

    out_nhwc = pl.pallas_call(
        _light_conv_kernel,
        out_shape=jax.ShapeDtypeStruct((N, H, W, Cout_pad), x_nchw.dtype),
        grid=(N, n_ct),
        in_specs=[
            pl.BlockSpec((1, H, W, Cin), lambda n, c: (n, 0, 0, 0)),
            pl.BlockSpec((Cin, TC), lambda n, c: (0, c)),
            pl.BlockSpec((1, TC), lambda n, c: (0, c)),
            pl.BlockSpec((K, K, TC), lambda n, c: (0, 0, c)),
            pl.BlockSpec((1, TC), lambda n, c: (0, c)),
            pl.BlockSpec(memory_space=pltpu.MemorySpace.SMEM),
        ],
        out_specs=pl.BlockSpec((1, H, W, TC), lambda n, c: (n, 0, 0, c)),
        compiler_params=pltpu.CompilerParams(**cp_kwargs),
    )(x_nhwc, w1_mat, b1f, wdw_hwc, b2f, lab)

    return jnp.transpose(out_nhwc[..., :Cout], (0, 3, 1, 2))  # back to NCHW


def _reference(x, params, eps=1e-5):
    """Pure-JAX NCHW reference matching the PyTorch module (eval-mode BN)."""
    y = jnp.einsum("nchw,oc->nohw", x, params["conv1_w"][:, :, 0, 0]) \
        + params["conv1_b"][None, :, None, None]
    y = (y - params["bn1_mean"][None, :, None, None]) \
        / jnp.sqrt(params["bn1_var"] + eps)[None, :, None, None] \
        * params["bn1_gamma"][None, :, None, None] + params["bn1_beta"][None, :, None, None]
    Cout = params["conv2_w"].shape[0]
    K = params["conv2_w"].shape[2]
    p = (K - 1) // 2
    z = lax.conv_general_dilated(
        y, params["conv2_w"], window_strides=(1, 1), padding=[(p, p), (p, p)],
        dimension_numbers=("NCHW", "OIHW", "NCHW"), feature_group_count=Cout,
    ) + params["conv2_b"][None, :, None, None]
    z = (z - params["bn2_mean"][None, :, None, None]) \
        / jnp.sqrt(params["bn2_var"] + eps)[None, :, None, None] \
        * params["bn2_gamma"][None, :, None, None] + params["bn2_beta"][None, :, None, None]
    z = jnp.maximum(z, 0.0)
    return params["lab_scale"][0] * z + params["lab_bias"][0]


def make_params(key, in_chs, out_chs, kernel_size):
    ks = jax.random.split(key, 12)
    u = lambda k, shape, lo, hi: jax.random.uniform(k, shape, jnp.float32, lo, hi)
    n = lambda k, shape, s: jax.random.normal(k, shape, jnp.float32) * s
    return dict(
        conv1_w=n(ks[0], (out_chs, in_chs, 1, 1), 0.5),
        conv1_b=n(ks[1], (out_chs,), 0.1),
        bn1_gamma=u(ks[2], (out_chs,), 0.5, 1.5),
        bn1_beta=n(ks[3], (out_chs,), 0.1),
        bn1_mean=n(ks[4], (out_chs,), 0.1),
        bn1_var=u(ks[5], (out_chs,), 0.5, 1.5),
        conv2_w=n(ks[6], (out_chs, 1, kernel_size, kernel_size), 0.5),
        conv2_b=n(ks[7], (out_chs,), 0.1),
        bn2_gamma=u(ks[8], (out_chs,), 0.5, 1.5),
        bn2_beta=n(ks[9], (out_chs,), 0.1),
        bn2_mean=n(ks[10], (out_chs,), 0.1),
        bn2_var=u(ks[11], (out_chs,), 0.5, 1.5),
        # LearnableAffineBlock parameters (use_lab=True path); non-trivial values
        # so the affine block is actually exercised.
        lab_scale=jnp.array([1.2], jnp.float32),
        lab_bias=jnp.array([0.15], jnp.float32),
    )


if __name__ == "__main__":
    N, Cin, Cout, H, W, K = 2, 4, 8, 16, 16, 3

    key = jax.random.PRNGKey(0)
    kx, kp = jax.random.split(key)
    x = jax.random.normal(kx, (N, Cin, H, W), jnp.float32)   # PyTorch NCHW input
    params = make_params(kp, Cin, Cout, K)

    fused = jax.jit(light_conv_bn_act)
    out = jax.block_until_ready(fused(x, params))
    ref = jax.block_until_ready(_reference(x, params))

    assert out.shape == (N, Cout, H, W)
    assert jnp.allclose(out, ref, rtol=1e-4, atol=1e-4), \
        f"max abs err {jnp.max(jnp.abs(out - ref))}"
    print("KERNEL_OK")
</pallas_src>

<mosaic_0001>
module attributes {stable_mosaic.version = 11 : i64} {
  func.func @_light_conv_kernel(%arg0: i32, %arg1: i32, %arg2: memref<1x16x16x4xf32, #tpu.memory_space<vmem>>, %arg3: memref<4x128xf32, #tpu.memory_space<vmem>>, %arg4: memref<1x128xf32, #tpu.memory_space<vmem>>, %arg5: memref<3x3x128xf32, #tpu.memory_space<vmem>>, %arg6: memref<1x128xf32, #tpu.memory_space<vmem>>, %arg7: memref<2xf32, #tpu.memory_space<smem>>, %arg8: memref<1x16x16x128xf32, #tpu.memory_space<vmem>>) attributes {dimension_semantics = [#tpu.dimension_semantics<parallel>, #tpu.dimension_semantics<arbitrary>], iteration_bounds = array<i64: 2, 1>, scalar_prefetch = 0 : i64, scratch_operands = 0 : i64, tpu.core_type = #tpu.core_type<tc>, window_params = [{transform_indices = @transform_0, window_bounds = array<i64: 1, 16, 16, 4>}, {transform_indices = @transform_1, window_bounds = array<i64: 4, 128>}, {transform_indices = @transform_2, window_bounds = array<i64: 1, 128>}, {transform_indices = @transform_3, window_bounds = array<i64: 3, 3, 128>}, {transform_indices = @transform_4, window_bounds = array<i64: 1, 128>}, {transform_indices = @transform_5, window_bounds = array<i64: 2>}, {transform_indices = @transform_6, window_bounds = array<i64: 1, 16, 16, 128>}]} {
    %c0 = arith.constant 0 : index
    %c0_0 = arith.constant 0 : index
    %c0_1 = arith.constant 0 : index
    %c0_2 = arith.constant 0 : index
    %0 = vector.load %arg2[%c0, %c0_0, %c0_1, %c0_2] : memref<1x16x16x4xf32, #tpu.memory_space<vmem>>, vector<1x16x16x4xf32>
    %1 = vector.shape_cast %0 : vector<1x16x16x4xf32> to vector<16x16x4xf32>
    %2 = vector.shape_cast %1 : vector<16x16x4xf32> to vector<256x4xf32>
    %c0_3 = arith.constant 0 : index
    %c0_4 = arith.constant 0 : index
    %3 = vector.load %arg3[%c0_3, %c0_4] : memref<4x128xf32, #tpu.memory_space<vmem>>, vector<4x128xf32>
    %cst = arith.constant dense<0.000000e+00> : vector<256x128xf32>
    %4 = tpu.matmul %2, %3, %cst {dimension_numbers = #tpu.dot_dimension_numbers<[1], [0], [0], [1], [0, 0, 1, 1], [], []>} : vector<256x4xf32>, vector<4x128xf32>, vector<256x128xf32> -> vector<256x128xf32>
    %c0_5 = arith.constant 0 : index
    %c0_6 = arith.constant 0 : index
    %5 = vector.load %arg4[%c0_5, %c0_6] : memref<1x128xf32, #tpu.memory_space<vmem>>, vector<1x128xf32>
    %6 = vector.broadcast %5 : vector<1x128xf32> to vector<256x128xf32>
    %7 = arith.addf %4, %6 : vector<256x128xf32>
    %8 = vector.shape_cast %7 : vector<256x128xf32> to vector<16x16x128xf32>
    %cst_7 = arith.constant 0.000000e+00 : f32
    %9 = vector.broadcast %cst_7 : f32 to vector<1x16x128xf32>
    %10 = tpu.concatenate %9, %8, %9 in 0 : vector<1x16x128xf32>, vector<16x16x128xf32>, vector<1x16x128xf32> -> vector<18x16x128xf32>
    %c0_8 = arith.constant 0 : index
    %c0_9 = arith.constant 0 : index
    %c0_10 = arith.constant 0 : index
    %11 = vector.load %arg5[%c0_8, %c0_9, %c0_10] : memref<3x3x128xf32, #tpu.memory_space<vmem>>, vector<3x3x128xf32>
    %12 = tpu.iota {dimensions = array<i32: 1>} : vector<1x16x1xi32>
    %c-1_i32 = arith.constant -1 : i32
    %13 = vector.broadcast %c-1_i32 : i32 to vector<1x16x1xi32>
    %14 = arith.addi %12, %13 : vector<1x16x1xi32>
    %c0_i32 = arith.constant 0 : i32
    %15 = vector.broadcast %c0_i32 : i32 to vector<1x16x1xi32>
    %16 = arith.cmpi sge, %14, %15 : vector<1x16x1xi32>
    %c-1_i32_11 = arith.constant -1 : i32
    %17 = vector.broadcast %c-1_i32_11 : i32 to vector<1x16x1xi32>
    %18 = arith.addi %12, %17 : vector<1x16x1xi32>
    %c16_i32 = arith.constant 16 : i32
    %19 = vector.broadcast %c16_i32 : i32 to vector<1x16x1xi32>
    %20 = arith.cmpi slt, %18, %19 : vector<1x16x1xi32>
    %21 = arith.andi %16, %20 : vector<1x16x1xi1>
    %c1_i32 = arith.constant 1 : i32
    %22 = tpu.dynamic_rotate %10 by %c1_i32 dim 1 : vector<18x16x128xf32>, i32 -> vector<18x16x128xf32>
    %cst_12 = arith.constant 0.000000e+00 : f32
    %23 = vector.shape_cast %21 : vector<1x16x1xi1> to vector<1x16x1xi1>
    %24 = vector.broadcast %23 : vector<1x16x1xi1> to vector<18x16x128xi1>
    %25 = vector.broadcast %cst_12 : f32 to vector<18x16x128xf32>
    %26 = arith.select %24, %22, %25 : vector<18x16x128xi1>, vector<18x16x128xf32>
    %c1_i32_13 = arith.constant 1 : i32
    %27 = vector.broadcast %c1_i32_13 : i32 to vector<1x16x1xi32>
    %28 = arith.addi %12, %27 : vector<1x16x1xi32>
    %c0_i32_14 = arith.constant 0 : i32
    %29 = vector.broadcast %c0_i32_14 : i32 to vector<1x16x1xi32>
    %30 = arith.cmpi sge, %28, %29 : vector<1x16x1xi32>
    %c1_i32_15 = arith.constant 1 : i32
    %31 = vector.broadcast %c1_i32_15 : i32 to vector<1x16x1xi32>
    %32 = arith.addi %12, %31 : vector<1x16x1xi32>
    %c16_i32_16 = arith.constant 16 : i32
    %33 = vector.broadcast %c16_i32_16 : i32 to vector<1x16x1xi32>
    %34 = arith.cmpi slt, %32, %33 : vector<1x16x1xi32>
    %35 = arith.andi %30, %34 : vector<1x16x1xi1>
    %c15_i32 = arith.constant 15 : i32
    %36 = tpu.dynamic_rotate %10 by %c15_i32 dim 1 : vector<18x16x128xf32>, i32 -> vector<18x16x128xf32>
    %cst_17 = arith.constant 0.000000e+00 : f32
    %37 = vector.shape_cast %35 : vector<1x16x1xi1> to vector<1x16x1xi1>
    %38 = vector.broadcast %37 : vector<1x16x1xi1> to vector<18x16x128xi1>
    %39 = vector.broadcast %cst_17 : f32 to vector<18x16x128xf32>
    %40 = arith.select %38, %36, %39 : vector<18x16x128xi1>, vector<18x16x128xf32>
    %c0_18 = arith.constant 0 : index
    %c0_19 = arith.constant 0 : index
    %41 = vector.load %arg6[%c0_18, %c0_19] : memref<1x128xf32, #tpu.memory_space<vmem>>, vector<1x128xf32>
    %42 = vector.shape_cast %41 : vector<1x128xf32> to vector<1x1x128xf32>
    %43 = vector.broadcast %42 : vector<1x1x128xf32> to vector<16x16x128xf32>
    %44 = vector.extract_strided_slice %26 {offsets = [0, 0, 0], sizes = [16, 16, 128], strides = [1, 1, 1]} : vector<18x16x128xf32> to vector<16x16x128xf32>
    %45 = vector.extract_strided_slice %11 {offsets = [0, 0, 0], sizes = [1, 1, 128], strides = [1, 1, 1]} : vector<3x3x128xf32> to vector<1x1x128xf32>
    %46 = vector.shape_cast %45 : vector<1x1x128xf32> to vector<128xf32>
    %47 = vector.shape_cast %46 : vector<128xf32> to vector<1x1x128xf32>
    %48 = vector.broadcast %47 : vector<1x1x128xf32> to vector<16x16x128xf32>
    %49 = arith.mulf %44, %48 : vector<16x16x128xf32>
    %50 = arith.addf %43, %49 : vector<16x16x128xf32>
    %51 = vector.extract_strided_slice %10 {offsets = [0, 0, 0], sizes = [16, 16, 128], strides = [1, 1, 1]} : vector<18x16x128xf32> to vector<16x16x128xf32>
    %52 = vector.extract_strided_slice %11 {offsets = [0, 1, 0], sizes = [1, 1, 128], strides = [1, 1, 1]} : vector<3x3x128xf32> to vector<1x1x128xf32>
    %53 = vector.shape_cast %52 : vector<1x1x128xf32> to vector<128xf32>
    %54 = vector.shape_cast %53 : vector<128xf32> to vector<1x1x128xf32>
    %55 = vector.broadcast %54 : vector<1x1x128xf32> to vector<16x16x128xf32>
    %56 = arith.mulf %51, %55 : vector<16x16x128xf32>
    %57 = arith.addf %50, %56 : vector<16x16x128xf32>
    %58 = vector.extract_strided_slice %40 {offsets = [0, 0, 0], sizes = [16, 16, 128], strides = [1, 1, 1]} : vector<18x16x128xf32> to vector<16x16x128xf32>
    %59 = vector.extract_strided_slice %11 {offsets = [0, 2, 0], sizes = [1, 1, 128], strides = [1, 1, 1]} : vector<3x3x128xf32> to vector<1x1x128xf32>
    %60 = vector.shape_cast %59 : vector<1x1x128xf32> to vector<128xf32>
    %61 = vector.shape_cast %60 : vector<128xf32> to vector<1x1x128xf32>
    %62 = vector.broadcast %61 : vector<1x1x128xf32> to vector<16x16x128xf32>
    %63 = arith.mulf %58, %62 : vector<16x16x128xf32>
    %64 = arith.addf %57, %63 : vector<16x16x128xf32>
    %65 = vector.extract_strided_slice %26 {offsets = [1, 0, 0], sizes = [16, 16, 128], strides = [1, 1, 1]} : vector<18x16x128xf32> to vector<16x16x128xf32>
    %66 = vector.extract_strided_slice %11 {offsets = [1, 0, 0], sizes = [1, 1, 128], strides = [1, 1, 1]} : vector<3x3x128xf32> to vector<1x1x128xf32>
    %67 = vector.shape_cast %66 : vector<1x1x128xf32> to vector<128xf32>
    %68 = vector.shape_cast %67 : vector<128xf32> to vector<1x1x128xf32>
    %69 = vector.broadcast %68 : vector<1x1x128xf32> to vector<16x16x128xf32>
    %70 = arith.mulf %65, %69 : vector<16x16x128xf32>
    %71 = arith.addf %64, %70 : vector<16x16x128xf32>
    %72 = vector.extract_strided_slice %10 {offsets = [1, 0, 0], sizes = [16, 16, 128], strides = [1, 1, 1]} : vector<18x16x128xf32> to vector<16x16x128xf32>
    %73 = vector.extract_strided_slice %11 {offsets = [1, 1, 0], sizes = [1, 1, 128], strides = [1, 1, 1]} : vector<3x3x128xf32> to vector<1x1x128xf32>
    %74 = vector.shape_cast %73 : vector<1x1x128xf32> to vector<128xf32>
    %75 = vector.shape_cast %74 : vector<128xf32> to vector<1x1x128xf32>
    %76 = vector.broadcast %75 : vector<1x1x128xf32> to vector<16x16x128xf32>
    %77 = arith.mulf %72, %76 : vector<16x16x128xf32>
    %78 = arith.addf %71, %77 : vector<16x16x128xf32>
    %79 = vector.extract_strided_slice %40 {offsets = [1, 0, 0], sizes = [16, 16, 128], strides = [1, 1, 1]} : vector<18x16x128xf32> to vector<16x16x128xf32>
    %80 = vector.extract_strided_slice %11 {offsets = [1, 2, 0], sizes = [1, 1, 128], strides = [1, 1, 1]} : vector<3x3x128xf32> to vector<1x1x128xf32>
    %81 = vector.shape_cast %80 : vector<1x1x128xf32> to vector<128xf32>
    %82 = vector.shape_cast %81 : vector<128xf32> to vector<1x1x128xf32>
    %83 = vector.broadcast %82 : vector<1x1x128xf32> to vector<16x16x128xf32>
    %84 = arith.mulf %79, %83 : vector<16x16x128xf32>
    %85 = arith.addf %78, %84 : vector<16x16x128xf32>
    %86 = vector.extract_strided_slice %26 {offsets = [2, 0, 0], sizes = [16, 16, 128], strides = [1, 1, 1]} : vector<18x16x128xf32> to vector<16x16x128xf32>
    %87 = vector.extract_strided_slice %11 {offsets = [2, 0, 0], sizes = [1, 1, 128], strides = [1, 1, 1]} : vector<3x3x128xf32> to vector<1x1x128xf32>
    %88 = vector.shape_cast %87 : vector<1x1x128xf32> to vector<128xf32>
    %89 = vector.shape_cast %88 : vector<128xf32> to vector<1x1x128xf32>
    %90 = vector.broadcast %89 : vector<1x1x128xf32> to vector<16x16x128xf32>
    %91 = arith.mulf %86, %90 : vector<16x16x128xf32>
    %92 = arith.addf %85, %91 : vector<16x16x128xf32>
    %93 = vector.extract_strided_slice %10 {offsets = [2, 0, 0], sizes = [16, 16, 128], strides = [1, 1, 1]} : vector<18x16x128xf32> to vector<16x16x128xf32>
    %94 = vector.extract_strided_slice %11 {offsets = [2, 1, 0], sizes = [1, 1, 128], strides = [1, 1, 1]} : vector<3x3x128xf32> to vector<1x1x128xf32>
    %95 = vector.shape_cast %94 : vector<1x1x128xf32> to vector<128xf32>
    %96 = vector.shape_cast %95 : vector<128xf32> to vector<1x1x128xf32>
    %97 = vector.broadcast %96 : vector<1x1x128xf32> to vector<16x16x128xf32>
    %98 = arith.mulf %93, %97 : vector<16x16x128xf32>
    %99 = arith.addf %92, %98 : vector<16x16x128xf32>
    %100 = vector.extract_strided_slice %40 {offsets = [2, 0, 0], sizes = [16, 16, 128], strides = [1, 1, 1]} : vector<18x16x128xf32> to vector<16x16x128xf32>
    %101 = vector.extract_strided_slice %11 {offsets = [2, 2, 0], sizes = [1, 1, 128], strides = [1, 1, 1]} : vector<3x3x128xf32> to vector<1x1x128xf32>
    %102 = vector.shape_cast %101 : vector<1x1x128xf32> to vector<128xf32>
    %103 = vector.shape_cast %102 : vector<128xf32> to vector<1x1x128xf32>
    %104 = vector.broadcast %103 : vector<1x1x128xf32> to vector<16x16x128xf32>
    %105 = arith.mulf %100, %104 : vector<16x16x128xf32>
    %106 = arith.addf %99, %105 : vector<16x16x128xf32>
    %cst_20 = arith.constant 0.000000e+00 : f32
    %107 = vector.broadcast %cst_20 : f32 to vector<16x16x128xf32>
    %108 = arith.maximumf %106, %107 : vector<16x16x128xf32>
    %c0_21 = arith.constant 0 : index
    %109 = memref.load %arg7[%c0_21] : memref<2xf32, #tpu.memory_space<smem>>
    %110 = vector.broadcast %109 : f32 to vector<16x16x128xf32>
    %111 = arith.mulf %110, %108 : vector<16x16x128xf32>
    %c1 = arith.constant 1 : index
    %112 = memref.load %arg7[%c1] : memref<2xf32, #tpu.memory_space<smem>>
    %113 = vector.broadcast %112 : f32 to vector<16x16x128xf32>
    %114 = arith.addf %111, %113 : vector<16x16x128xf32>
    %c0_22 = arith.constant 0 : index
    %c0_23 = arith.constant 0 : index
    %c0_24 = arith.constant 0 : index
    %c0_25 = arith.constant 0 : index
    %115 = vector.load %arg8[%c0_22, %c0_23, %c0_24, %c0_25] : memref<1x16x16x128xf32, #tpu.memory_space<vmem>>, vector<1x16x16x128xf32>
    %116 = vector.shape_cast %115 : vector<1x16x16x128xf32> to vector<16x16x128xf32>
    %117 = vector.shape_cast %114 : vector<16x16x128xf32> to vector<1x16x16x128xf32>
    tpu.vector_store %arg8[%c0_22, %c0_23, %c0_24, %c0_25], %117 {strides = array<i32>} : memref<1x16x16x128xf32, #tpu.memory_space<vmem>>, vector<1x16x16x128xf32>,
    return
  }
  func.func @transform_0(%arg0: i32, %arg1: i32) -> (i32, i32, i32, i32) {
    %c0_i32 = arith.constant 0 : i32
    %c0_i32_0 = arith.constant 0 : i32
    %c0_i32_1 = arith.constant 0 : i32
    %c0_i32_2 = arith.constant 0 : i32
    return %arg0, %c0_i32, %c0_i32_0, %c0_i32_1 : i32, i32, i32, i32
  }
  func.func @transform_1(%arg0: i32, %arg1: i32) -> (i32, i32) {
    %c0_i32 = arith.constant 0 : i32
    %c0_i32_0 = arith.constant 0 : i32
    return %c0_i32, %arg1 : i32, i32
  }
  func.func @transform_2(%arg0: i32, %arg1: i32) -> (i32, i32) {
    %c0_i32 = arith.constant 0 : i32
    %c0_i32_0 = arith.constant 0 : i32
    return %c0_i32, %arg1 : i32, i32
  }
  func.func @transform_3(%arg0: i32, %arg1: i32) -> (i32, i32, i32) {
    %c0_i32 = arith.constant 0 : i32
    %c0_i32_0 = arith.constant 0 : i32
    %c0_i32_1 = arith.constant 0 : i32
    return %c0_i32, %c0_i32_0, %arg1 : i32, i32, i32
  }
  func.func @transform_4(%arg0: i32, %arg1: i32) -> (i32, i32) {
    %c0_i32 = arith.constant 0 : i32
    %c0_i32_0 = arith.constant 0 : i32
    return %c0_i32, %arg1 : i32, i32
  }
  func.func @transform_5(%arg0: i32, %arg1: i32) -> i32 {
    %c0_i32 = arith.constant 0 : i32
    %c0_i32_0 = arith.constant 0 : i32
    return %c0_i32 : i32
  }
  func.func @transform_6(%arg0: i32, %arg1: i32) -> (i32, i32, i32, i32) {
    %c0_i32 = arith.constant 0 : i32
    %c0_i32_0 = arith.constant 0 : i32
    %c0_i32_1 = arith.constant 0 : i32
    return %arg0, %c0_i32, %c0_i32_0, %arg1 : i32, i32, i32, i32
  }
}

</mosaic_0001>

<bundles_post_ra>
// kernel: light_conv_bn_act.1
= control target key start
LH: loop header
LB: loop body
LE: loop exit
PB: predicated region body
PF: predicated region fallthrough
CT: control target
= control target key end

     0   :  { %11 = vsyncpa [#allocation3], 0  ;;  %s2091_s21 = smov 0   ;;  %s2093_s22 = smov 0   ;;  %s3434_s0 = inlined_call_operand.vmem [shape: f32[2,16,16,4], index: 0, kind: input, shape index: {}]   ;;  %s3435_s1 = inlined_call_operand.vmem [shape: f32[4,128], index: 1, kind: input, shape index: {}]   ;;  %s3436_s2 = inlined_call_operand.vmem [shape: f32[1,128], index: 2, kind: input, shape index: {}]   ;;  %s3437_s3 = inlined_call_operand.vmem [shape: f32[3,3,128], index: 3, kind: input, shape index: {}]   ;;  %s3438_s4 = inlined_call_operand.vmem [shape: f32[1,128], index: 4, kind: input, shape index: {}]   ;;  %s3439_s5 = inlined_call_operand.vmem [shape: f32[2], index: 5, kind: input, shape index: {}]   ;;  %s3440_s6 = inlined_call_operand.vmem [shape: f32[2,16,16,128], index: 6, kind: output, shape index: {}]  }
   0x1   :  { %s2095_s23 = smov 0  }
   0x2 LB: > { %s1835_s24 = sadd.s32 4294967295, %s2053_s23   ;;  %s29_s25 = sadd.s32 1, %s2049_s22  ;;  %s2053_s23 = sphi %s2095_s23, %s17_s23   ;;  %s2049_s22 = sphi %s2093_s22, %s3520_s22   ;;  %s2045_s21 = sphi %s2091_s21, %s3519_s21  }
   0x3   : > { %p31_p0 = scmp.ge.s32.totalorder %s29_s25, 2  ;;  %p1837_p1 = scmp.ge.s32.totalorder %s2053_s23, 1 }
   0x4   : > { %p213_p2 = scmp.lt.s32.totalorder %s2053_s23, 3  ;;  %p2116_p4 = scmp.eq.s32.totalorder %s1835_s24, 0 }
   0x5   : > { %s3522_s25 = smov (%p31_p0, %s29_s25), 0  ;;  %s252_s30 = sshll.u32 %s3439_s5, 4  ;;  %s253_s30 = int_to_ptr.vmem [resolvable:$true] %s252_s30 }
   0x6   : > { %p2112_p3 = pnand %p1837_p1, %p213_p2  ;;  %s2012_s7 = scalar_lea.vmem %s253_s30, 16 }
   0x7   : > { %p2013_p7 = scmp.ne.s32.totalorder %s253_s30, %s2012_s7  ;;  %p2020_p11 = scmp.lt.s32.totalorder %s253_s30, %s253_s30 }
   0x8   : > { %p1979_p5 = pneg %p2112_p3  ;;  %p2021_p12 = scmp.lt.s32.totalorder %s2012_s7, %s2012_s7 }
   0xa   : > { %p1980_p6 = pnand %p2116_p4, %p1979_p5  ;;  %p2022_p13 = por %p2021_p12, %p2020_p11 }
   0xc   : > { %p2014_p8 = pneg %p1980_p6 }
   0xe   : > { %p2015_p9 = pnand %p2014_p8, %p2013_p7 }
  0x10   : > { %p2016_p10 = pneg %p2015_p9 }
  0x12   : > { %p2023_p0 = pnand %p2022_p13, %p2016_p10 }
  0x14   : > { %2026 = shalt.err (!%p2023_p0)
}
  0x15   : > { %s2055_s8 = smov [#allocation2]   ;;  %273 = sbr.rel (%p2112_p3) target bundleno = 475 (0x1db), region = 44 }
  0x16   : > { %1982 = dma.vmem_to_smem (!%p1980_p6), %s253_s30, 16, %s2055_s8, [#allocation3]  }
  0x1c   : > { %2040 = dma.done.wait (%p2116_p4), [#allocation3], 16  }
  0x1d   : > { %2042 = vsyncadd (%p2116_p4), [#allocation3], 4294967280 }
  0x1e   : > { %279 = sfence }
  0x1f   : > { %v380_v0 = vld [vmem:[%s3435_s1] sm:$0xf]  ;;  %vm485_vm0 = vcmask 1043456   ;;  %p321_p1 = scmp.lt.s32.totalorder %s2045_s21, 1  ;;  %vm388_vm1 = vcmask 31744   ;;  %v717_v33 = vlaneseq  ;;  %s1591_s19 = sld [smem:[#allocation2]] }
  0x20   : > { %1923 = vmatprep.subr.msk.mxu0 %vm485_vm0, %v380_v0  ;;  %1973 = vmatprep.subr.msk.mxu1 %vm485_vm0, %v380_v0  ;;  %v714_v36 = vld [vmem:[%s3437_s3] sm:$0x7]  ;;  %s2235_s20 = sld [smem:[#allocation2 + $0x1]]  ;;  %v715_v47 = vld [vmem:[%s3437_s3 + $0x4] sm:$0x7] }
  0x21   : > { %1924 = vmatpush3.msk.msra.mxu0 %vm485_vm0, %v380_v0  ;;  %1974 = vmatpush3.msk.msra.mxu1 %vm485_vm0, %v380_v0  ;;  %s3524_s21 = smov (!%p321_p1, %s2045_s21), 1  ;;  %v2212_v34 = vshrl.u32 %v717_v33, 7  ;;  %v2228_v42 = vld [vmem:[%s3438_s4] ss:$0 sm:$0xff]  ;;  %v716_v48 = vld [vmem:[%s3437_s3 + $0x8] sm:$0x7] }
  0x22   : > { %s1888_s11 = sshll.u32 %s3524_s21, 8  ;;  %v2251_v51 = vld [vmem:[%s3436_s2] ss:$0 sm:$0xff] }
  0x23   : > { %s2146_s14 = scalar_lea.vmem %s3434_s0, %s1888_s11  ;;  %v951_v35 = vsub.s32 0, %v2212_v34  ;;  %v1019_v38 = vsub.s32 1, %v2212_v34  ;;  %v1086_v40 = vsub.s32 2, %v2212_v34  ;;  %v719_v43 = vadd.s32 8, %v2212_v34  ;;  %s2528_s9 = scalar_lea.vmem %s3440_s6, %s1888_s11 }
  0x24   : > { %v348_v1 = vld [vmem:[%s2146_s14] sm:$0xff]  ;;  %v349_v3 = vld [vmem:[%s2146_s14 + $0x8] sm:$0xff]  ;;  %v350_v5 = vld [vmem:[%s2146_s14 + $0x10] sm:$0xff]  ;;  %v2244_v49 = vadd.s32 4294967295, %v2212_v34  ;;  %vm760_vm3 = vcmp.lt.s32.totalorder %v2212_v34, 1  ;;  %vm871_vm4 = vcmp.lt.s32.totalorder %v2212_v34, 7 }
  0x25   : > { %v364_v2 = vld [vmem:[%s2146_s14 + $0x80] sm:$0xff]  ;;  %1925 = vmatprep.mubr.msk.f32.mxu0 %vm388_vm1, %v348_v1  ;;  %v365_v4 = vld [vmem:[%s2146_s14 + $0x88] sm:$0xff]  ;;  %v366_v6 = vld [vmem:[%s2146_s14 + $0x90] sm:$0xff]  ;;  %v2218_v37 = vrot.slane %v714_v36, %v951_v35  ;;  %v2221_v39 = vrot.slane %v714_v36, %v1019_v38  ;;  %v2231_v44 = vrot.slane %v714_v36, %v1086_v40  ;;  %v2246_v50 = vadd.s32 1, %v719_v43 }
  0x26   : > { %1949 = vmatprep.mubr.msk.f32.mxu1 %vm388_vm1, %v364_v2  ;;  %1926 = vmatmul.mubr.msk.f32.vlgmr.msra.gmra.mrb[0].mxu0 %vm388_vm1, %v349_v3  ;;  %v351_v7 = vld [vmem:[%s2146_s14 + $0x18] sm:$0xff]  ;;  %v352_v9 = vld [vmem:[%s2146_s14 + $0x20] sm:$0xff]  ;;  %v353_v11 = vld [vmem:[%s2146_s14 + $0x28] sm:$0xff]  ;;  %v2254_v54 = vrot.slane %v715_v47, %v1019_v38  ;;  %v2256_v55 = vrot.slane %v716_v48, %v951_v35  ;;  %v2258_v56 = vrot.slane %v716_v48, %v1019_v38  ;;  %vm722_vm2 = vcmp.ge.s32.totalorder %v2244_v49, 0 }
  0x27   : > { %1950 = vmatmul.mubr.msk.f32.vlgmr.msra.gmra.mrb[0].mxu1 %vm388_vm1, %v365_v4  ;;  %1928 = vmatprep.mubr.msk.f32.mxu0 %vm388_vm1, %v350_v5  ;;  %v367_v8 = vld [vmem:[%s2146_s14 + $0x98] sm:$0xff]  ;;  %v368_v10 = vld [vmem:[%s2146_s14 + $0xa0] sm:$0xff]  ;;  %v369_v12 = vld [vmem:[%s2146_s14 + $0xa8] sm:$0xff]  ;;  %v953_v41 = vmul.f32 0.0, %v2218_v37  ;;  %v1021_v46 = vmul.f32 0.0, %v2221_v39  ;;  %v1088_v53 = vmul.f32 0.0, %v2231_v44  ;;  %v2260_v57 = vrot.slane %v716_v48, %v1086_v40 }
  0x28   : > { %1952 = vmatprep.mubr.msk.f32.mxu1 %vm388_vm1, %v366_v6  ;;  %v354_v13 = vld [vmem:[%s2146_s14 + $0x30] sm:$0xff]  ;;  %v355_v15 = vld [vmem:[%s2146_s14 + $0x38] sm:$0xff]  ;;  %v356_v17 = vld [vmem:[%s2146_s14 + $0x40] sm:$0xff]  ;;  %v2265_v60 = vrot.slane %v715_v47, %v951_v35  ;;  %vm836_vm5 = vcmp.lt.s32.totalorder %v2246_v50, 16  ;;  %v2270_v0 = vrot.slane %v715_v47, %v1086_v40  ;;  %v2276_v5 = vstv %s1591_s19 }
  0x29   : > { %v370_v14 = vld [vmem:[%s2146_s14 + $0xb0] sm:$0xff]  ;;  %v371_v16 = vld [vmem:[%s2146_s14 + $0xb8] sm:$0xff]  ;;  %v372_v18 = vld [vmem:[%s2146_s14 + $0xc0] sm:$0xff]  ;;  %v985_v45 = vadd.f32 %v2228_v42, %v953_v41 }
  0x2a   : > { %1929 = vmatmul.mubr.msk.f32.gmra.mrb[2].mxu0 %vm388_vm1, %v351_v7  ;;  %v357_v19 = vld [vmem:[%s2146_s14 + $0x48] sm:$0xff]  ;;  %v358_v21 = vld [vmem:[%s2146_s14 + $0x50] sm:$0xff]  ;;  %v359_v23 = vld [vmem:[%s2146_s14 + $0x58] sm:$0xff] }
  0x2b   : > { %1953 = vmatmul.mubr.msk.f32.gmra.mrb[2].mxu1 %vm388_vm1, %v367_v8  ;;  %1931 = vmatprep.mubr.msk.f32.mxu0 %vm388_vm1, %v352_v9  ;;  %v373_v20 = vld [vmem:[%s2146_s14 + $0xc8] sm:$0xff]  ;;  %v374_v22 = vld [vmem:[%s2146_s14 + $0xd0] sm:$0xff]  ;;  %v375_v24 = vld [vmem:[%s2146_s14 + $0xd8] sm:$0xff]  ;;  %v1052_v52 = vadd.f32 %v1021_v46, %v985_v45  ;;  %v2280_v9 = vstv %s2235_s20 }
  0x2c   : > { %1955 = vmatprep.mubr.msk.f32.mxu1 %vm388_vm1, %v368_v10  ;;  %v360_v25 = vld [vmem:[%s2146_s14 + $0x60] sm:$0xff]  ;;  %v361_v27 = vld [vmem:[%s2146_s14 + $0x68] sm:$0xff]  ;;  %v362_v29 = vld [vmem:[%s2146_s14 + $0x70] sm:$0xff] }
  0x2d   : > { %v376_v26 = vld [vmem:[%s2146_s14 + $0xe0] sm:$0xff]  ;;  %v377_v28 = vld [vmem:[%s2146_s14 + $0xe8] sm:$0xff]  ;;  %v378_v30 = vld [vmem:[%s2146_s14 + $0xf0] sm:$0xff]  ;;  %v1120_v3 = vadd.f32 %v1088_v53, %v1052_v52 }
  0x2e   : > { %1932 = vmatmul.mubr.msk.f32.gmra.mrb[4].mxu0 %vm388_vm1, %v353_v11  ;;  %v363_v31 = vld [vmem:[%s2146_s14 + $0x78] sm:$0xff] }
  0x2f   : > { %1956 = vmatmul.mubr.msk.f32.gmra.mrb[4].mxu1 %vm388_vm1, %v369_v12  ;;  %1934 = vmatprep.mubr.msk.f32.mxu0 %vm388_vm1, %v354_v13  ;;  %v379_v32 = vld [vmem:[%s2146_s14 + $0xf8] sm:$0xff] }
  0x30   : > { %1958 = vmatprep.mubr.msk.f32.mxu1 %vm388_vm1, %v370_v14 }
  0x32   : > { %1935 = vmatmul.mubr.msk.f32.gmra.mrb[6].mxu0 %vm388_vm1, %v355_v15 }
  0x33   : > { %1959 = vmatmul.mubr.msk.f32.gmra.mrb[6].mxu1 %vm388_vm1, %v371_v16  ;;  %1937 = vmatprep.mubr.msk.f32.mxu0 %vm388_vm1, %v356_v17 }
  0x34   : > { %1961 = vmatprep.mubr.msk.f32.mxu1 %vm388_vm1, %v372_v18 }
  0x36   : > { %1938 = vmatmul.mubr.msk.f32.gmra.mrb[8].mxu0 %vm388_vm1, %v357_v19 }
  0x37   : > { %1962 = vmatmul.mubr.msk.f32.gmra.mrb[8].mxu1 %vm388_vm1, %v373_v20  ;;  %1940 = vmatprep.mubr.msk.f32.mxu0 %vm388_vm1, %v358_v21 }
  0x38   : > { %1964 = vmatprep.mubr.msk.f32.mxu1 %vm388_vm1, %v374_v22 }
  0x3a   : > { %1941 = vmatmul.mubr.msk.f32.gmra.mrb[10].mxu0 %vm388_vm1, %v359_v23 }
  0x3b   : > { %1965 = vmatmul.mubr.msk.f32.gmra.mrb[10].mxu1 %vm388_vm1, %v375_v24  ;;  %1943 = vmatprep.mubr.msk.f32.mxu0 %vm388_vm1, %v360_v25 }
  0x3c   : > { %1967 = vmatprep.mubr.msk.f32.mxu1 %vm388_vm1, %v376_v26 }
  0x3e   : > { %1944 = vmatmul.mubr.msk.f32.gmra.mrb[12].mxu0 %vm388_vm1, %v361_v27 }
  0x3f   : > { %1968 = vmatmul.mubr.msk.f32.gmra.mrb[12].mxu1 %vm388_vm1, %v377_v28  ;;  %1946 = vmatprep.mubr.msk.f32.mxu0 %vm388_vm1, %v362_v29 }
  0x40   : > { %1970 = vmatprep.mubr.msk.f32.mxu1 %vm388_vm1, %v378_v30 }
  0x42   : > { %1947 = vmatmul.mubr.msk.f32.gmra.mrb[14].mxu0 %vm388_vm1, %v363_v31 }
  0x43   : > { %1971 = vmatmul.mubr.msk.f32.gmra.mrb[14].mxu1 %vm388_vm1, %v379_v32 }
  0xf9   : > { %v1927_v58 = vpop.f32.mrb[0].mxu0 }
  0xfa   : > { %v1951_v59 = vpop.f32.mrb[0].mxu1  ;;  %v561_v61 = vadd.f32 %v1927_v58, %v2251_v51  ;;  %v555_v63 = vpop.f32.mrb[1].mxu0 }
  0xfb   : > { %v641_v62 = vadd.f32 %v1951_v59, %v2251_v51  ;;  %v635_v1 = vpop.f32.mrb[1].mxu1  ;;  %v556_v2 = vadd.f32 %v2251_v51, %v555_v63 }
  0xfc   : > { %v2274_v4 = vadd.f32 %v2251_v51, %v635_v1  ;;  %v744_v6 = vrot.slane %v561_v61, 7  ;;  %v855_v7 = vrot.slane %v561_v61, 1  ;;  %v1023_v8 = vmul.f32 %v2221_v39, %v561_v61 }
  0xfd   : > { %v1225_v10 = vmul.f32 %v2254_v54, %v561_v61  ;;  %v752_v11 = vrot.slane %v641_v62, 7  ;;  %v863_v12 = vrot.slane %v641_v62, 1  ;;  %v2284_v13 = vmul.f32 %v2221_v39, %v641_v62  ;;  %v2286_v14 = vpop.f32.mrb[2].mxu0 }
  0xfe   : > { %v2288_v15 = vpop.f32.mrb[2].mxu1  ;;  %v2291_v16 = vmul.f32 %v2254_v54, %v641_v62  ;;  %v2294_v17 = vmul.f32 %v2258_v56, %v641_v62  ;;  %v728_v18 = vrot.slane %v556_v2, 7  ;;  %v839_v19 = vrot.slane %v556_v2, 1  ;;  %v2296_v20 = vpop.f32.mrb[3].mxu0 }
  0xff   : > { %v2298_v21 = vpop.f32.mrb[3].mxu1  ;;  %v1022_v22 = vmul.f32 %v2221_v39, %v556_v2  ;;  %v1224_v23 = vmul.f32 %v2254_v54, %v556_v2  ;;  %v736_v24 = vrot.slane %v2274_v4, 7  ;;  %v847_v25 = vrot.slane %v2274_v4, 1 }
 0x100   : > { %3443 = vst [vmem:[#allocation5_spill] sm:$0xff] %v2291_v16  ;;  %3444 = vst [vmem:[#allocation6_spill] sm:$0xff] %v2294_v17  ;;  %v761_v26 = vsel %vm760_vm3, %v728_v18, %v744_v6  ;;  %v777_v27 = vsel %vm760_vm3, %v744_v6, %v728_v18  ;;  %v872_v28 = vsel %vm871_vm4, %v839_v19, %v855_v7 }
 0x101   : > { %v888_v29 = vsel %vm871_vm4, %v855_v7, %v839_v19  ;;  %v799_v30 = vsel %vm722_vm2, %v777_v27, 0.0  ;;  %v956_v32 = vmul.f32 %v2218_v37, %v761_v26  ;;  %v1090_v33 = vmul.f32 %v2231_v44, %v872_v28  ;;  %v2318_v35 = vpop.f32.mrb[4].mxu0 }
 0x102   : > { %v911_v31 = vsel %vm836_vm5, %v888_v29, 0.0  ;;  %v2320_v36 = vpop.f32.mrb[4].mxu1  ;;  %v955_v38 = vmul.f32 %v2218_v37, %v799_v30  ;;  %v1156_v41 = vmul.f32 %v2265_v60, %v799_v30  ;;  %v1157_v43 = vmul.f32 %v2265_v60, %v761_v26  ;;  %v2326_v45 = vpop.f32.mrb[5].mxu0 }
 0x103   : > { %v1091_v40 = vmul.f32 %v2231_v44, %v911_v31  ;;  %v2328_v46 = vpop.f32.mrb[5].mxu1  ;;  %v988_v47 = vadd.f32 %v2228_v42, %v956_v32  ;;  %v1292_v48 = vmul.f32 %v2270_v0, %v872_v28  ;;  %v1293_v52 = vmul.f32 %v2270_v0, %v911_v31 }
 0x104   : > { %v769_v53 = vsel %vm760_vm3, %v736_v24, %v752_v11  ;;  %v987_v58 = vadd.f32 %v2228_v42, %v955_v38  ;;  %v1188_v59 = vadd.f32 %v1156_v41, %v1120_v3  ;;  %v1189_v61 = vadd.f32 %v1157_v43, %v1120_v3 }
 0x105   : > { %v785_v62 = vsel %vm760_vm3, %v752_v11, %v736_v24  ;;  %v1055_v63 = vadd.f32 %v1023_v8, %v988_v47  ;;  %v880_v2 = vsel %vm871_vm4, %v847_v25, %v863_v12  ;;  %v896_v6 = vsel %vm871_vm4, %v863_v12, %v847_v25  ;;  %v2344_v7 = vpop.f32.mrb[6].mxu0 }
 0x106   : > { %v815_v1 = vsel %vm722_vm2, %v785_v62, 0.0  ;;  %3445 = vst [vmem:[#allocation7_spill] sm:$0xff] %v2344_v7  ;;  %v2346_v18 = vpop.f32.mrb[6].mxu1  ;;  %v1054_v19 = vadd.f32 %v1022_v22, %v987_v58  ;;  %v1256_v26 = vadd.f32 %v1224_v23, %v1188_v59  ;;  %v1257_v3 = vadd.f32 %v1225_v10, %v1189_v61  ;;  %v2350_v8 = vpop.f32.mrb[7].mxu0 }
 0x107   : > { %3446 = vst [vmem:[#allocation8_spill] sm:$0xff] %v2346_v18  ;;  %v927_v11 = vsel %vm836_vm5, %v896_v6, 0.0  ;;  %3447 = vst [vmem:[#allocation9_spill] sm:$0xff] %v2350_v8  ;;  %v2352_v24 = vpop.f32.mrb[7].mxu1  ;;  %v2354_v27 = vadd.f32 %v1091_v40, %v1055_v63  ;;  %v971_v28 = vmul.f32 %v2218_v37, %v815_v1  ;;  %v972_v12 = vmul.f32 %v2218_v37, %v769_v53 }
 0x108   : > { %3448 = vst [vmem:[#allocation10_spill] sm:$0xff] %v2352_v24  ;;  %v1038_v25 = vmul.f32 %v2221_v39, %v2274_v4  ;;  %v2360_v29 = vadd.f32 %v1090_v33, %v1054_v19  ;;  %v2362_v22 = vadd.f32 %v1292_v48, %v1256_v26  ;;  %v2364_v10 = vadd.f32 %v1293_v52, %v1257_v3 }
 0x109   : > { %v1106_v23 = vmul.f32 %v2231_v44, %v880_v2  ;;  %v1003_v30 = vadd.f32 %v2228_v42, %v971_v28  ;;  %v1004_v31 = vadd.f32 %v2228_v42, %v972_v12  ;;  %v1107_v32 = vmul.f32 %v2231_v44, %v927_v11  ;;  %v2373_v40 = vpop.f32.mrb[8].mxu0 }
 0x10a   : > { %v2371_v38 = vmul.f32 %v2265_v60, %v815_v1  ;;  %3450 = vst [vmem:[#allocation12_spill] sm:$0xff] %v2373_v40  ;;  %v2375_v41 = vpop.f32.mrb[8].mxu1  ;;  %v2378_v33 = vmul.f32 %v2265_v60, %v769_v53  ;;  %v2382_v43 = vmul.f32 %v2254_v54, %v2274_v4  ;;  %v2385_v47 = vmul.f32 %v2270_v0, %v880_v2  ;;  %v2390_v52 = vpop.f32.mrb[9].mxu0 }
 0x10b   : > { %3451 = vst [vmem:[#allocation13_spill] sm:$0xff] %v2375_v41  ;;  %v2388_v48 = vmul.f32 %v2270_v0, %v927_v11  ;;  %3456 = vst [vmem:[#allocation18_spill] sm:$0xff] %v2390_v52  ;;  %v2392_v58 = vpop.f32.mrb[9].mxu1  ;;  %v1070_v59 = vadd.f32 %v1038_v25, %v1003_v30  ;;  %v1071_v61 = vadd.f32 %v2284_v13, %v1004_v31 }
 0x10c   : > { %3449 = vst [vmem:[#allocation11_spill] sm:$0xff] %v2371_v38  ;;  %3452 = vst [vmem:[#allocation14_spill] sm:$0xff] %v2378_v33  ;;  %v2396_v62 = vmul.f32 %v2256_v55, %v815_v1  ;;  %v2399_v63 = vmul.f32 %v2256_v55, %v769_v53  ;;  %v2403_v6 = vmul.f32 %v2258_v56, %v2274_v4 }
 0x10d   : > { %3453 = vst [vmem:[#allocation15_spill] sm:$0xff] %v2382_v43  ;;  %3454 = vst [vmem:[#allocation16_spill] sm:$0xff] %v2385_v47  ;;  %v2406_v19 = vmul.f32 %v2260_v57, %v880_v2  ;;  %v571_v26 = vadd.f32 %v2286_v14, %v2251_v51  ;;  %v2412_v3 = vadd.f32 %v2288_v15, %v2251_v51  ;;  %v2424_v2 = vpop.f32.mrb[10].mxu0 }
 0x10e   : > { %3455 = vst [vmem:[#allocation17_spill] sm:$0xff] %v2388_v48  ;;  %3457 = vst [vmem:[#allocation19_spill] sm:$0xff] %v2392_v58  ;;  %v2414_v13 = vadd.f32 %v1106_v23, %v1070_v59  ;;  %v2416_v1 = vadd.f32 %v1107_v32, %v1071_v61  ;;  %v566_v53 = vadd.f32 %v2251_v51, %v2296_v20  ;;  %v2426_v28 = vpop.f32.mrb[10].mxu1  ;;  %v2432_v23 = vpop.f32.mrb[11].mxu0 }
 0x10f   : > { %3458 = vst [vmem:[#allocation20_spill] sm:$0xff] %v2396_v62  ;;  %3459 = vst [vmem:[#allocation21_spill] sm:$0xff] %v2399_v63  ;;  %v2422_v4 = vadd.f32 %v2251_v51, %v2298_v21  ;;  %v2429_v14 = vmul.f32 %v2260_v57, %v927_v11  ;;  %v745_v15 = vrot.slane %v571_v26, 7  ;;  %v856_v12 = vrot.slane %v571_v26, 1  ;;  %v2434_v30 = vpop.f32.mrb[11].mxu1 }
 0x110   : > { %3460 = vst [vmem:[#allocation22_spill] sm:$0xff] %v2403_v6  ;;  %3461 = vst [vmem:[#allocation23_spill] sm:$0xff] %v2406_v19  ;;  %v1025_v25 = vmul.f32 %v2221_v39, %v571_v26  ;;  %v1227_v20 = vmul.f32 %v2254_v54, %v571_v26  ;;  %v1429_v21 = vmul.f32 %v2258_v56, %v571_v26  ;;  %v753_v31 = vrot.slane %v2412_v3, 7 }
 0x111   : > { %3462 = vst [vmem:[#allocation24_spill] sm:$0xff] %v2424_v2  ;;  %3463 = vst [vmem:[#allocation25_spill] sm:$0xff] %v2426_v28  ;;  %v864_v32 = vrot.slane %v2412_v3, 1  ;;  %v2442_v11 = vmul.f32 %v2221_v39, %v2412_v3  ;;  %v2446_v59 = vmul.f32 %v2254_v54, %v2412_v3  ;;  %v729_v61 = vrot.slane %v566_v53, 7  ;;  %v2452_v6 = vpop.f32.mrb[12].mxu0 }
 0x112   : > { %3464 = vst [vmem:[#allocation26_spill] sm:$0xff] %v2429_v14  ;;  %3465 = vst [vmem:[#allocation27_spill] sm:$0xff] %v2432_v23  ;;  %v840_v14 = vrot.slane %v566_v53, 1  ;;  %v1024_v19 = vmul.f32 %v2221_v39, %v566_v53  ;;  %v1226_v17 = vmul.f32 %v2254_v54, %v566_v53  ;;  %v1428_v26 = vmul.f32 %v2258_v56, %v566_v53  ;;  %v2454_v48 = vpop.f32.mrb[12].mxu1  ;;  %v2464_v38 = vpop.f32.mrb[13].mxu0 }
 0x113   : > { %3466 = vst [vmem:[#allocation28_spill] sm:$0xff] %v2434_v30  ;;  %v737_v47 = vrot.slane %v2422_v4, 7  ;;  %3467 = vst [vmem:[#allocation29_spill] sm:$0xff] %v2452_v6  ;;  %v762_v63 = vsel %vm760_vm3, %v729_v61, %v745_v15  ;;  %v778_v43 = vsel %vm760_vm3, %v745_v15, %v729_v61  ;;  %v2480_v23 = vpop.f32.mrb[13].mxu1 }
 0x114   : > { %3468 = vst [vmem:[#allocation30_spill] sm:$0xff] %v2454_v48  ;;  %v873_v62 = vsel %vm871_vm4, %v840_v14, %v856_v12  ;;  %v889_v16 = vsel %vm871_vm4, %v856_v12, %v840_v14  ;;  %3469 = vst [vmem:[#allocation31_spill] sm:$0xff] %v2464_v38  ;;  %v801_v53 = vsel %vm722_vm2, %v778_v43, 0.0  ;;  %v958_v48 = vmul.f32 %v2218_v37, %v762_v63 }
 0x115   : > { %v913_v33 = vsel %vm836_vm5, %v889_v16, 0.0  ;;  %v1092_v6 = vmul.f32 %v2231_v44, %v873_v62  ;;  %v957_v15 = vmul.f32 %v2218_v37, %v801_v53  ;;  %v1158_v30 = vmul.f32 %v2265_v60, %v801_v53  ;;  %3470 = vst [vmem:[#allocation32_spill] sm:$0xff] %v2480_v23 }
 0x116   : > { %v1093_v61 = vmul.f32 %v2231_v44, %v913_v33  ;;  %v1159_v14 = vmul.f32 %v2265_v60, %v762_v63  ;;  %v990_v12 = vadd.f32 %v2228_v42, %v958_v48  ;;  %v1294_v38 = vmul.f32 %v2270_v0, %v873_v62 }
 0x117   : > { %v1295_v43 = vmul.f32 %v2270_v0, %v913_v33  ;;  %v1360_v16 = vmul.f32 %v2256_v55, %v801_v53  ;;  %v989_v28 = vadd.f32 %v2228_v42, %v957_v15  ;;  %v1190_v2 = vadd.f32 %v1158_v30, %v2360_v29 }
 0x118   : > { %v1191_v58 = vadd.f32 %v1159_v14, %v2354_v27  ;;  %v1361_v52 = vmul.f32 %v2256_v55, %v762_v63  ;;  %v1057_v41 = vadd.f32 %v1025_v25, %v990_v12  ;;  %v1495_v48 = vmul.f32 %v2260_v57, %v873_v62 }
 0x119   : > { %v1392_v40 = vadd.f32 %v1360_v16, %v2362_v22  ;;  %v1496_v24 = vmul.f32 %v2260_v57, %v913_v33  ;;  %v1056_v8 = vadd.f32 %v1024_v19, %v989_v28  ;;  %v1258_v18 = vadd.f32 %v1226_v17, %v1190_v2 }
 0x11a   : > { %v1259_v53 = vadd.f32 %v1227_v20, %v1191_v58  ;;  %v1393_v23 = vadd.f32 %v1361_v52, %v2364_v10  ;;  %v2490_v7 = vadd.f32 %v1093_v61, %v1057_v41  ;;  %v770_v27 = vsel %vm760_vm3, %v737_v47, %v753_v31 }
 0x11b   : > { %v1459_v15 = vadd.f32 %v1428_v26, %v1392_v40  ;;  %v786_v29 = vsel %vm760_vm3, %v753_v31, %v737_v47  ;;  %v2496_v63 = vadd.f32 %v1092_v6, %v1056_v8  ;;  %v2498_v22 = vadd.f32 %v1294_v38, %v1258_v18 }
 0x11c   : > { %v2500_v62 = vadd.f32 %v1295_v43, %v1259_v53  ;;  %v1460_v33 = vadd.f32 %v1429_v21, %v1393_v23  ;;  %v817_v10 = vsel %vm722_vm2, %v786_v29, 0.0  ;;  %v848_v41 = vrot.slane %v2422_v4, 1 }
 0x11d   : > { %v1527_v17 = vadd.f32 %v1495_v48, %v1459_v15  ;;  %v974_v40 = vmul.f32 %v2218_v37, %v770_v27  ;;  %v973_v58 = vmul.f32 %v2218_v37, %v817_v10  ;;  %v1040_v8 = vmul.f32 %v2221_v39, %v2422_v4  ;;  %v2546_v15 = vpop.f32.mrb[14].mxu0 }
 0x11e   : > { %v1528_v52 = vadd.f32 %v1496_v24, %v1460_v33  ;;  %v1174_v18 = vmul.f32 %v2265_v60, %v817_v10  ;;  %v881_v47 = vsel %vm871_vm4, %v848_v41, %v864_v32  ;;  %v897_v6 = vsel %vm871_vm4, %v864_v32, %v848_v41 }
 0x11f   : > { %v1559_v38 = vmax.f32 %v1527_v17, 0.0  ;;  %v1006_v19 = vadd.f32 %v2228_v42, %v974_v40  ;;  %v929_v24 = vsel %vm836_vm5, %v897_v6, 0.0  ;;  %v1005_v28 = vadd.f32 %v2228_v42, %v973_v58 }
 0x120   : > { %v1560_v2 = vmax.f32 %v1528_v52, 0.0  ;;  %v1108_v25 = vmul.f32 %v2231_v44, %v881_v47  ;;  %v1109_v20 = vmul.f32 %v2231_v44, %v929_v24  ;;  %v1175_v21 = vmul.f32 %v2265_v60, %v770_v27 }
 0x121   : > { %v1593_v23 = vmul.f32 %v2276_v5, %v1559_v38  ;;  %v1073_v30 = vadd.f32 %v2442_v11, %v1006_v19  ;;  %v1072_v32 = vadd.f32 %v1040_v8, %v1005_v28  ;;  %v1206_v26 = vadd.f32 %v1174_v18, %v2414_v13  ;;  %v2585_v38 = vpop.f32.mrb[15].mxu0 }
 0x122   : > { %v1594_v31 = vmul.f32 %v2276_v5, %v1560_v2  ;;  %v1242_v11 = vmul.f32 %v2254_v54, %v2422_v4  ;;  %v2536_v61 = vmul.f32 %v2258_v56, %v2412_v3  ;;  %v1207_v43 = vadd.f32 %v1175_v21, %v2416_v1  ;;  %3477 = vst [vmem:[#allocation39_spill] sm:$0xff] %v2585_v38 }
 0x123   : > { %v1627_v14 = vadd.f32 %v2280_v9, %v1593_v23  ;;  %v2539_v12 = vadd.f32 %v1109_v20, %v1073_v30  ;;  %v2543_v48 = vadd.f32 %v1108_v25, %v1072_v32  ;;  %v1310_v13 = vmul.f32 %v2270_v0, %v881_v47 }
 0x124   : > { %3471 = vst [vmem:[#allocation33_spill] sm:$0xff] %v2536_v61  ;;  %v1628_v16 = vadd.f32 %v2280_v9, %v1594_v31  ;;  %v1274_v53 = vadd.f32 %v1242_v11, %v1206_v26  ;;  %v1275_v29 = vadd.f32 %v2446_v59, %v1207_v43  ;;  %v1311_v3 = vmul.f32 %v2270_v0, %v929_v24 }
 0x125   : > { %1659 = vst [vmem:[%s2528_s9] sm:$0xff] %v1627_v14  ;;  %v2552_v33 = vmul.f32 %v2256_v55, %v817_v10  ;;  %v2555_v17 = vmul.f32 %v2256_v55, %v770_v27  ;;  %v2562_v41 = vmul.f32 %v2258_v56, %v2422_v4  ;;  %v2565_v40 = vmul.f32 %v2260_v57, %v881_v47 }
 0x126   : > { %1660 = vst [vmem:[%s2528_s9 + $0x8] sm:$0xff] %v1628_v16  ;;  %v2558_v1 = vadd.f32 %v1310_v13, %v1274_v53  ;;  %v581_v59 = vadd.f32 %v2318_v35, %v2251_v51  ;;  %v2569_v52 = vadd.f32 %v1311_v3, %v1275_v29  ;;  %v2573_v10 = vadd.f32 %v2320_v36, %v2251_v51 }
 0x127   : > { %3472 = vst [vmem:[#allocation34_spill] sm:$0xff] %v2552_v33  ;;  %3473 = vst [vmem:[#allocation35_spill] sm:$0xff] %v2555_v17  ;;  %v576_v27 = vadd.f32 %v2251_v51, %v2326_v45  ;;  %v2579_v58 = vadd.f32 %v2251_v51, %v2328_v46  ;;  %v2582_v4 = vmul.f32 %v2260_v57, %v929_v24 }
 0x128   : > { %3474 = vst [vmem:[#allocation36_spill] sm:$0xff] %v2562_v41  ;;  %3475 = vst [vmem:[#allocation37_spill] sm:$0xff] %v2565_v40  ;;  %v746_v8 = vrot.slane %v581_v59, 7  ;;  %v857_v18 = vrot.slane %v581_v59, 1  ;;  %v1027_v35 = vmul.f32 %v2221_v39, %v581_v59  ;;  %v1229_v47 = vmul.f32 %v2254_v54, %v581_v59 }
 0x129   : > { %3476 = vst [vmem:[#allocation38_spill] sm:$0xff] %v2582_v4  ;;  %v1431_v36 = vmul.f32 %v2258_v56, %v581_v59  ;;  %v754_v6 = vrot.slane %v2573_v10, 7  ;;  %v865_v45 = vrot.slane %v2573_v10, 1  ;;  %v2593_v46 = vmul.f32 %v2221_v39, %v2573_v10 }
 0x12a   : > { %v2597_v19 = vmul.f32 %v2254_v54, %v2573_v10  ;;  %v730_v2 = vrot.slane %v576_v27, 7  ;;  %v841_v24 = vrot.slane %v576_v27, 1  ;;  %v1026_v28 = vmul.f32 %v2221_v39, %v576_v27 }
 0x12b   : > { %v1228_v25 = vmul.f32 %v2254_v54, %v576_v27  ;;  %v1430_v23 = vmul.f32 %v2258_v56, %v576_v27  ;;  %v738_v30 = vrot.slane %v2579_v58, 7 }
 0x12c   : > { %v763_v20 = vsel %vm760_vm3, %v730_v2, %v746_v8  ;;  %v779_v21 = vsel %vm760_vm3, %v746_v8, %v730_v2  ;;  %v874_v31 = vsel %vm871_vm4, %v841_v24, %v857_v18  ;;  %v890_v32 = vsel %vm871_vm4, %v857_v18, %v841_v24  ;;  %v2625_v18 = vpop.f32.mrb[14].mxu1 }
 0x12d   : > { %v803_v26 = vsel %vm722_vm2, %v779_v21, 0.0  ;;  %v915_v11 = vsel %vm836_vm5, %v890_v32, 0.0  ;;  %v960_v14 = vmul.f32 %v2218_v37, %v763_v20  ;;  %v1094_v43 = vmul.f32 %v2231_v44, %v874_v31  ;;  %3478 = vst [vmem:[#allocation40_spill] sm:$0xff] %v2625_v18 }
 0x12e   : > { %v959_v16 = vmul.f32 %v2218_v37, %v803_v26  ;;  %v1095_v53 = vmul.f32 %v2231_v44, %v915_v11  ;;  %v1160_v13 = vmul.f32 %v2265_v60, %v803_v26  ;;  %v1161_v29 = vmul.f32 %v2265_v60, %v763_v20 }
 0x12f   : > { %v992_v3 = vadd.f32 %v2228_v42, %v960_v14  ;;  %v1296_v59 = vmul.f32 %v2270_v0, %v874_v31  ;;  %v1297_v27 = vmul.f32 %v2270_v0, %v915_v11  ;;  %v1362_v8 = vmul.f32 %v2256_v55, %v803_v26 }
 0x130   : > { %v991_v2 = vadd.f32 %v2228_v42, %v959_v16  ;;  %v1192_v24 = vadd.f32 %v1160_v13, %v2496_v63  ;;  %v1193_v21 = vadd.f32 %v1161_v29, %v2490_v7  ;;  %v1363_v32 = vmul.f32 %v2256_v55, %v763_v20 }
 0x131   : > { %v1059_v40 = vadd.f32 %v1027_v35, %v992_v3  ;;  %v1394_v4 = vadd.f32 %v1362_v8, %v2498_v22  ;;  %v1497_v14 = vmul.f32 %v2260_v57, %v874_v31  ;;  %v1498_v41 = vmul.f32 %v2260_v57, %v915_v11  ;;  %v2641_v35 = vpop.f32.mrb[15].mxu1 }
 0x132   : > { %v1058_v61 = vadd.f32 %v1026_v28, %v991_v2  ;;  %v1260_v33 = vadd.f32 %v1228_v25, %v1192_v24  ;;  %v1261_v26 = vadd.f32 %v1229_v47, %v1193_v21  ;;  %v1395_v17 = vadd.f32 %v1363_v32, %v2500_v62  ;;  %3479 = vst [vmem:[#allocation41_spill] sm:$0xff] %v2641_v35 }
 0x133   : > { %v2635_v18 = vadd.f32 %v1095_v53, %v1059_v40  ;;  %v1461_v16 = vadd.f32 %v1430_v23, %v1394_v4  ;;  %v771_v7 = vsel %vm760_vm3, %v738_v30, %v754_v6  ;;  %v787_v63 = vsel %vm760_vm3, %v754_v6, %v738_v30 }
 0x134   : > { %v2643_v22 = vadd.f32 %v1094_v43, %v1058_v61  ;;  %v2645_v20 = vadd.f32 %v1296_v59, %v1260_v33  ;;  %v2647_v28 = vadd.f32 %v1297_v27, %v1261_v26  ;;  %v1462_v47 = vadd.f32 %v1431_v36, %v1395_v17 }
 0x135   : > { %v1529_v25 = vadd.f32 %v1497_v14, %v1461_v16  ;;  %v819_v62 = vsel %vm722_vm2, %v787_v63, 0.0  ;;  %v849_v40 = vrot.slane %v2579_v58, 1  ;;  %v976_v4 = vmul.f32 %v2218_v37, %v771_v7 }
 0x136   : > { %v1530_v23 = vadd.f32 %v1498_v41, %v1462_v47  ;;  %v975_v6 = vmul.f32 %v2218_v37, %v819_v62  ;;  %v1042_v61 = vmul.f32 %v2221_v39, %v2579_v58  ;;  %v1176_v33 = vmul.f32 %v2265_v60, %v819_v62 }
 0x137   : > { %v1561_v30 = vmax.f32 %v1529_v25, 0.0  ;;  %v882_v17 = vsel %vm871_vm4, %v849_v40, %v865_v45  ;;  %v898_v36 = vsel %vm871_vm4, %v865_v45, %v849_v40  ;;  %v1008_v31 = vadd.f32 %v2228_v42, %v976_v4 }
 0x138   : > { %v1562_v11 = vmax.f32 %v1530_v23, 0.0  ;;  %v931_v41 = vsel %vm836_vm5, %v898_v36, 0.0  ;;  %v1007_v43 = vadd.f32 %v2228_v42, %v975_v6  ;;  %v1110_v53 = vmul.f32 %v2231_v44, %v882_v17  ;;  %v3480_v23 = vld [vmem:[#allocation7_spill] sm:$0xff] }
 0x139   : > { %v1595_v13 = vmul.f32 %v2276_v5, %v1561_v30  ;;  %v1075_v29 = vadd.f32 %v2593_v46, %v1008_v31  ;;  %v1111_v3 = vmul.f32 %v2231_v44, %v931_v41  ;;  %v1177_v59 = vmul.f32 %v2265_v60, %v771_v7 }
 0x13a   : > { %v1596_v45 = vmul.f32 %v2276_v5, %v1562_v11  ;;  %v1074_v27 = vadd.f32 %v1042_v61, %v1007_v43  ;;  %v1208_v8 = vadd.f32 %v1176_v33, %v2543_v48  ;;  %v1244_v2 = vmul.f32 %v2254_v54, %v2579_v58 }
 0x13b   : > { %v1447_v24 = vmul.f32 %v2258_v56, %v2573_v10  ;;  %v1629_v21 = vadd.f32 %v2280_v9, %v1595_v13  ;;  %v2677_v32 = vadd.f32 %v1111_v3, %v1075_v29  ;;  %v1209_v46 = vadd.f32 %v1177_v59, %v2539_v12  ;;  %v3482_v59 = vld [vmem:[#allocation9_spill] sm:$0xff] }
 0x13c   : > { %v1630_v14 = vadd.f32 %v2280_v9, %v1596_v45  ;;  %v2681_v26 = vadd.f32 %v1110_v53, %v1074_v27  ;;  %v1276_v16 = vadd.f32 %v1244_v2, %v1208_v8  ;;  %v1312_v63 = vmul.f32 %v2270_v0, %v882_v17  ;;  %v3483_v27 = vld [vmem:[#allocation10_spill] sm:$0xff] }
 0x13d   : > { %1661 = vst [vmem:[%s2528_s9 + $0x10] sm:$0xff] %v1629_v21  ;;  %v1277_v48 = vadd.f32 %v2597_v19, %v1209_v46  ;;  %v1313_v47 = vmul.f32 %v2270_v0, %v931_v41  ;;  %v1378_v10 = vmul.f32 %v2256_v55, %v819_v62  ;;  %v1379_v25 = vmul.f32 %v2256_v55, %v771_v7  ;;  %v3481_v62 = vld [vmem:[#allocation8_spill] sm:$0xff]  ;;  %v3485_v46 = vld [vmem:[#allocation13_spill] sm:$0xff] }
 0x13e   : > { %1662 = vst [vmem:[%s2528_s9 + $0x18] sm:$0xff] %v1630_v14  ;;  %v2690_v40 = vadd.f32 %v1312_v63, %v1276_v16  ;;  %v1446_v12 = vmul.f32 %v2258_v56, %v2579_v58  ;;  %v1513_v4 = vmul.f32 %v2260_v57, %v882_v17  ;;  %v591_v6 = vadd.f32 %v3480_v23, %v2251_v51  ;;  %v3486_v16 = vld [vmem:[#allocation18_spill] sm:$0xff] }
 0x13f   : > { %v2697_v61 = vadd.f32 %v1313_v47, %v1277_v48  ;;  %v1410_v19 = vadd.f32 %v1378_v10, %v2558_v1  ;;  %v1411_v33 = vadd.f32 %v1379_v25, %v2569_v52  ;;  %v2703_v7 = vadd.f32 %v3481_v62, %v2251_v51 }
 0x140   : > { %v1514_v30 = vmul.f32 %v2260_v57, %v931_v41  ;;  %v747_v36 = vrot.slane %v591_v6, 7  ;;  %v858_v31 = vrot.slane %v591_v6, 1  ;;  %v1029_v58 = vmul.f32 %v2221_v39, %v591_v6 }
 0x141   : > { %v1477_v17 = vadd.f32 %v1446_v12, %v1410_v19  ;;  %v1478_v11 = vadd.f32 %v1447_v24, %v1411_v33  ;;  %v1231_v43 = vmul.f32 %v2254_v54, %v591_v6  ;;  %v1433_v53 = vmul.f32 %v2258_v56, %v591_v6  ;;  %v3484_v24 = vld [vmem:[#allocation12_spill] sm:$0xff] }
 0x142   : > { %v755_v1 = vrot.slane %v2703_v7, 7  ;;  %v2713_v13 = vmul.f32 %v2221_v39, %v2703_v7  ;;  %v2717_v41 = vmul.f32 %v2254_v54, %v2703_v7  ;;  %v586_v45 = vadd.f32 %v2251_v51, %v3482_v59 }
 0x143   : > { %v1545_v29 = vadd.f32 %v1513_v4, %v1477_v17  ;;  %v1546_v3 = vadd.f32 %v1514_v30, %v1478_v11  ;;  %v2723_v8 = vadd.f32 %v2251_v51, %v3483_v27  ;;  %v2727_v2 = vmul.f32 %v2258_v56, %v2703_v7 }
 0x144   : > { %v2731_v21 = vadd.f32 %v3484_v24, %v2251_v51  ;;  %v2735_v14 = vadd.f32 %v3485_v46, %v2251_v51  ;;  %v2739_v63 = vadd.f32 %v2251_v51, %v3486_v16  ;;  %v731_v10 = vrot.slane %v586_v45, 7 }
 0x145   : > { %v1577_v48 = vmax.f32 %v1545_v29, 0.0  ;;  %v1578_v47 = vmax.f32 %v1546_v3, 0.0  ;;  %v842_v25 = vrot.slane %v586_v45, 1  ;;  %v1028_v12 = vmul.f32 %v2221_v39, %v586_v45 }
 0x146   : > { %v1230_v4 = vmul.f32 %v2254_v54, %v586_v45  ;;  %v1432_v23 = vmul.f32 %v2258_v56, %v586_v45  ;;  %v739_v6 = vrot.slane %v2723_v8, 7  ;;  %v764_v62 = vsel %vm760_vm3, %v731_v10, %v747_v36 }
 0x147   : > { %v1611_v19 = vmul.f32 %v2276_v5, %v1577_v48  ;;  %v1612_v33 = vmul.f32 %v2276_v5, %v1578_v47  ;;  %v780_v30 = vsel %vm760_vm3, %v747_v36, %v731_v10  ;;  %v875_v11 = vsel %vm871_vm4, %v842_v25, %v858_v31 }
 0x148   : > { %v805_v17 = vsel %vm722_vm2, %v780_v30, 0.0  ;;  %v891_v29 = vsel %vm871_vm4, %v858_v31, %v842_v25  ;;  %v962_v3 = vmul.f32 %v2218_v37, %v764_v62  ;;  %v1096_v46 = vmul.f32 %v2231_v44, %v875_v11 }
 0x149   : > { %v1645_v59 = vadd.f32 %v2280_v9, %v1611_v19  ;;  %v1646_v45 = vadd.f32 %v2280_v9, %v1612_v33  ;;  %v917_v27 = vsel %vm836_vm5, %v891_v29, 0.0  ;;  %v961_v36 = vmul.f32 %v2218_v37, %v805_v17 }
 0x14a   : > { %v994_v24 = vadd.f32 %v2228_v42, %v962_v3  ;;  %v1097_v16 = vmul.f32 %v2231_v44, %v917_v27  ;;  %v1162_v48 = vmul.f32 %v2265_v60, %v805_v17  ;;  %v1163_v47 = vmul.f32 %v2265_v60, %v764_v62 }
 0x14b   : > { %1677 = vst [vmem:[%s2528_s9 + $0x90] sm:$0xff] %v1645_v59  ;;  %1678 = vst [vmem:[%s2528_s9 + $0x98] sm:$0xff] %v1646_v45  ;;  %v993_v31 = vadd.f32 %v2228_v42, %v961_v36  ;;  %v1298_v10 = vmul.f32 %v2270_v0, %v875_v11  ;;  %v1299_v25 = vmul.f32 %v2270_v0, %v917_v27 }
 0x14c   : > { %v1061_v19 = vadd.f32 %v1029_v58, %v994_v24  ;;  %v1194_v33 = vadd.f32 %v1162_v48, %v2643_v22  ;;  %v1364_v30 = vmul.f32 %v2256_v55, %v805_v17  ;;  %v1365_v29 = vmul.f32 %v2256_v55, %v764_v62 }
 0x14d   : > { %v1060_v3 = vadd.f32 %v1028_v12, %v993_v31  ;;  %v1195_v52 = vadd.f32 %v1163_v47, %v2635_v18  ;;  %v1499_v59 = vmul.f32 %v2260_v57, %v875_v11  ;;  %v1500_v45 = vmul.f32 %v2260_v57, %v917_v27 }
 0x14e   : > { %v2779_v36 = vadd.f32 %v1097_v16, %v1061_v19  ;;  %v1262_v35 = vadd.f32 %v1230_v4, %v1194_v33  ;;  %v1396_v38 = vadd.f32 %v1364_v30, %v2645_v20  ;;  %v1397_v58 = vadd.f32 %v1365_v29, %v2647_v28 }
 0x14f   : > { %v2783_v24 = vadd.f32 %v1096_v46, %v1060_v3  ;;  %v1263_v22 = vadd.f32 %v1231_v43, %v1195_v52  ;;  %v772_v62 = vsel %vm760_vm3, %v739_v6, %v755_v1  ;;  %v788_v18 = vsel %vm760_vm3, %v755_v1, %v739_v6 }
 0x150   : > { %v2789_v12 = vadd.f32 %v1298_v10, %v1262_v35  ;;  %v1463_v17 = vadd.f32 %v1432_v23, %v1396_v38  ;;  %v1464_v11 = vadd.f32 %v1433_v53, %v1397_v58  ;;  %v821_v4 = vsel %vm722_vm2, %v788_v18, 0.0  ;;  %v3489_v18 = vld [vmem:[#allocation19_spill] sm:$0xff] }
 0x151   : > { %v2793_v27 = vadd.f32 %v1299_v25, %v1263_v22  ;;  %v850_v20 = vrot.slane %v2723_v8, 1  ;;  %v977_v28 = vmul.f32 %v2218_v37, %v821_v4  ;;  %v978_v43 = vmul.f32 %v2218_v37, %v772_v62 }
 0x152   : > { %v1531_v52 = vadd.f32 %v1499_v59, %v1463_v17  ;;  %v1532_v46 = vadd.f32 %v1500_v45, %v1464_v11  ;;  %v1044_v1 = vmul.f32 %v2221_v39, %v2723_v8  ;;  %v1178_v35 = vmul.f32 %v2265_v60, %v821_v4 }
 0x153   : > { %v3487_v38 = vrot.slane %v2703_v7, 1  ;;  %v1009_v16 = vadd.f32 %v2228_v42, %v977_v28  ;;  %v1010_v48 = vadd.f32 %v2228_v42, %v978_v43  ;;  %v1179_v7 = vmul.f32 %v2265_v60, %v772_v62 }
 0x154   : > { %v1563_v31 = vmax.f32 %v1531_v52, 0.0  ;;  %v1564_v47 = vmax.f32 %v1532_v46, 0.0  ;;  %v1210_v59 = vadd.f32 %v1178_v35, %v2681_v26  ;;  %v1246_v45 = vmul.f32 %v2254_v54, %v2723_v8 }
 0x155   : > { %v883_v53 = vsel %vm871_vm4, %v850_v20, %v3487_v38  ;;  %v3488_v23 = vmov %v3487_v38  ;;  %v1076_v19 = vadd.f32 %v1044_v1, %v1009_v16  ;;  %v1077_v33 = vadd.f32 %v2713_v13, %v1010_v48 }
 0x156   : > { %v899_v6 = vsel %vm871_vm4, %v3488_v23, %v850_v20  ;;  %v1112_v25 = vmul.f32 %v2231_v44, %v883_v53  ;;  %v1597_v29 = vmul.f32 %v2276_v5, %v1563_v31  ;;  %v1598_v3 = vmul.f32 %v2276_v5, %v1564_v47 }
 0x157   : > { %v933_v10 = vsel %vm836_vm5, %v899_v6, 0.0  ;;  %v1211_v13 = vadd.f32 %v1179_v7, %v2677_v32  ;;  %v2829_v17 = vadd.f32 %v2251_v51, %v3489_v18  ;;  %v1278_v28 = vadd.f32 %v1246_v45, %v1210_v59 }
 0x158   : > { %v1113_v30 = vmul.f32 %v2231_v44, %v933_v10  ;;  %v2822_v58 = vadd.f32 %v1112_v25, %v1076_v19  ;;  %v1631_v11 = vadd.f32 %v2280_v9, %v1597_v29  ;;  %v1632_v20 = vadd.f32 %v2280_v9, %v1598_v3 }
 0x159   : > { %v1314_v26 = vmul.f32 %v2270_v0, %v883_v53  ;;  %v1279_v43 = vadd.f32 %v2717_v41, %v1211_v13  ;;  %v1315_v52 = vmul.f32 %v2270_v0, %v933_v10  ;;  %v1380_v46 = vmul.f32 %v2256_v55, %v821_v4 }
 0x15a   : > { %v2824_v22 = vadd.f32 %v1113_v30, %v1077_v33  ;;  %v1381_v1 = vmul.f32 %v2256_v55, %v772_v62  ;;  %1663 = vst [vmem:[%s2528_s9 + $0x20] sm:$0xff] %v1631_v11  ;;  %1664 = vst [vmem:[%s2528_s9 + $0x28] sm:$0xff] %v1632_v20  ;;  %v1448_v51 = vmul.f32 %v2258_v56, %v2723_v8  ;;  %v748_v4 = vrot.slane %v2731_v21, 7 }
 0x15b   : > { %v2840_v32 = vadd.f32 %v1314_v26, %v1278_v28  ;;  %v1515_v35 = vmul.f32 %v2260_v57, %v883_v53  ;;  %v1516_v38 = vmul.f32 %v2260_v57, %v933_v10  ;;  %v2846_v23 = vadd.f32 %v1315_v52, %v1279_v43 }
 0x15c   : > { %v1412_v41 = vadd.f32 %v1380_v46, %v2690_v40  ;;  %v1413_v6 = vadd.f32 %v1381_v1, %v2697_v61  ;;  %v859_v62 = vrot.slane %v2731_v21, 1  ;;  %v1031_v16 = vmul.f32 %v2221_v39, %v2731_v21 }
 0x15d   : > { %v1233_v8 = vmul.f32 %v2254_v54, %v2731_v21  ;;  %v1435_v53 = vmul.f32 %v2258_v56, %v2731_v21  ;;  %v756_v40 = vrot.slane %v2735_v14, 7  ;;  %v867_v61 = vrot.slane %v2735_v14, 1 }
 0x15e   : > { %v1479_v48 = vadd.f32 %v1448_v51, %v1412_v41  ;;  %v1480_v31 = vadd.f32 %v2727_v2, %v1413_v6  ;;  %v2863_v47 = vmul.f32 %v2221_v39, %v2735_v14  ;;  %v2867_v10 = vmul.f32 %v2254_v54, %v2735_v14 }
 0x15f   : > { %v732_v25 = vrot.slane %v2739_v63, 7  ;;  %v843_v19 = vrot.slane %v2739_v63, 1  ;;  %v2873_v2 = vmul.f32 %v2258_v56, %v2735_v14  ;;  %v1030_v30 = vmul.f32 %v2221_v39, %v2739_v63  ;;  %v2954_v14 = vld [vmem:[%s3438_s4] ss:$0 sm:$0xff] }
 0x160   : > { %v1547_v21 = vadd.f32 %v1515_v35, %v1479_v48  ;;  %v1548_v33 = vadd.f32 %v1516_v38, %v1480_v31  ;;  %v1232_v43 = vmul.f32 %v2254_v54, %v2739_v63 }
 0x161   : > { %v765_v7 = vsel %vm760_vm3, %v732_v25, %v748_v4  ;;  %v781_v29 = vsel %vm760_vm3, %v748_v4, %v732_v25  ;;  %v876_v3 = vsel %vm871_vm4, %v843_v19, %v859_v62  ;;  %v892_v59 = vsel %vm871_vm4, %v859_v62, %v843_v19 }
 0x162   : > { %v1579_v45 = vmax.f32 %v1547_v21, 0.0  ;;  %v1580_v13 = vmax.f32 %v1548_v33, 0.0  ;;  %v807_v18 = vsel %vm722_vm2, %v781_v29, 0.0  ;;  %v919_v11 = vsel %vm836_vm5, %v892_v59, 0.0 }
 0x163   : > { %v963_v20 = vmul.f32 %v2218_v37, %v807_v18  ;;  %v964_v28 = vmul.f32 %v2218_v37, %v765_v7  ;;  %v1098_v26 = vmul.f32 %v2231_v44, %v876_v3  ;;  %v1164_v1 = vmul.f32 %v2265_v60, %v807_v18 }
 0x164   : > { %v1613_v52 = vmul.f32 %v2276_v5, %v1579_v45  ;;  %v1614_v46 = vmul.f32 %v2276_v5, %v1580_v13  ;;  %v1165_v51 = vmul.f32 %v2265_v60, %v765_v7  ;;  %v1099_v41 = vmul.f32 %v2231_v44, %v919_v11 }
 0x165   : > { %v995_v35 = vadd.f32 %v2228_v42, %v963_v20  ;;  %v996_v38 = vadd.f32 %v2228_v42, %v964_v28  ;;  %v1300_v6 = vmul.f32 %v2270_v0, %v876_v3  ;;  %v1196_v48 = vadd.f32 %v1164_v1, %v2783_v24 }
 0x166   : > { %v1647_v4 = vadd.f32 %v2280_v9, %v1613_v52  ;;  %v1648_v62 = vadd.f32 %v2280_v9, %v1614_v46  ;;  %v1197_v31 = vadd.f32 %v1165_v51, %v2779_v36  ;;  %v1366_v21 = vmul.f32 %v2256_v55, %v807_v18 }
 0x167   : > { %v1062_v25 = vadd.f32 %v1030_v30, %v995_v35  ;;  %v1063_v19 = vadd.f32 %v1031_v16, %v996_v38  ;;  %v1367_v33 = vmul.f32 %v2256_v55, %v765_v7  ;;  %v1264_v42 = vadd.f32 %v1232_v43, %v1196_v48 }
 0x168   : > { %1679 = vst [vmem:[%s2528_s9 + $0xa0] sm:$0xff] %v1647_v4  ;;  %1680 = vst [vmem:[%s2528_s9 + $0xa8] sm:$0xff] %v1648_v62  ;;  %v1265_v29 = vadd.f32 %v1233_v8, %v1197_v31  ;;  %v1301_v59 = vmul.f32 %v2270_v0, %v919_v11  ;;  %v1434_v45 = vmul.f32 %v2258_v56, %v2739_v63  ;;  %v740_v8 = vrot.slane %v2829_v17, 7 }
 0x169   : > { %v2913_v13 = vadd.f32 %v1098_v26, %v1062_v25  ;;  %v2915_v24 = vadd.f32 %v1099_v41, %v1063_v19  ;;  %v1398_v36 = vadd.f32 %v1366_v21, %v2789_v12  ;;  %v1399_v16 = vadd.f32 %v1367_v33, %v2793_v27 }
 0x16a   : > { %v2919_v30 = vadd.f32 %v1300_v6, %v1264_v42  ;;  %v2921_v7 = vadd.f32 %v1301_v59, %v1265_v29  ;;  %v1501_v18 = vmul.f32 %v2260_v57, %v876_v3  ;;  %v1502_v63 = vmul.f32 %v2260_v57, %v919_v11 }
 0x16b   : > { %v1465_v20 = vadd.f32 %v1434_v45, %v1398_v36  ;;  %v1466_v28 = vadd.f32 %v1435_v53, %v1399_v16  ;;  %v851_v26 = vrot.slane %v2829_v17, 1  ;;  %v773_v43 = vsel %vm760_vm3, %v740_v8, %v756_v40 }
 0x16c   : > { %v789_v12 = vsel %vm760_vm3, %v756_v40, %v740_v8  ;;  %v1046_v27 = vmul.f32 %v2221_v39, %v2829_v17  ;;  %v1248_v3 = vmul.f32 %v2254_v54, %v2829_v17  ;;  %v980_v51 = vmul.f32 %v2218_v37, %v773_v43 }
 0x16d   : > { %v1533_v52 = vadd.f32 %v1501_v18, %v1465_v20  ;;  %v1534_v46 = vadd.f32 %v1502_v63, %v1466_v28  ;;  %v823_v53 = vsel %vm722_vm2, %v789_v12, 0.0  ;;  %v884_v11 = vsel %vm871_vm4, %v851_v26, %v867_v61 }
 0x16e   : > { %v900_v40 = vsel %vm871_vm4, %v867_v61, %v851_v26  ;;  %v979_v1 = vmul.f32 %v2218_v37, %v823_v53  ;;  %v1114_v35 = vmul.f32 %v2231_v44, %v884_v11  ;;  %v1180_v4 = vmul.f32 %v2265_v60, %v823_v53 }
 0x16f   : > { %v1565_v38 = vmax.f32 %v1533_v52, 0.0  ;;  %v1566_v41 = vmax.f32 %v1534_v46, 0.0  ;;  %v935_v6 = vsel %vm836_vm5, %v900_v40, 0.0  ;;  %v1012_v62 = vadd.f32 %v2954_v14, %v980_v51  ;;  %v3491_v46 = vld [vmem:[#allocation25_spill] sm:$0xff] }
 0x170   : > { %v1011_v61 = vadd.f32 %v2954_v14, %v979_v1  ;;  %v1115_v48 = vmul.f32 %v2231_v44, %v935_v6  ;;  %v1181_v31 = vmul.f32 %v2265_v60, %v773_v43  ;;  %v1212_v21 = vadd.f32 %v1180_v4, %v2822_v58  ;;  %v3493_v1 = vld [vmem:[#allocation28_spill] sm:$0xff] }
 0x171   : > { %v1599_v25 = vmul.f32 %v2276_v5, %v1565_v38  ;;  %v1600_v19 = vmul.f32 %v2276_v5, %v1566_v41  ;;  %v1316_v33 = vmul.f32 %v2270_v0, %v884_v11  ;;  %v1079_v29 = vadd.f32 %v2863_v47, %v1012_v62  ;;  %v3494_v41 = vld [vmem:[#allocation29_spill] sm:$0xff] }
 0x172   : > { %v1078_v42 = vadd.f32 %v1046_v27, %v1011_v61  ;;  %v1213_v59 = vadd.f32 %v1181_v31, %v2824_v22  ;;  %v1317_v45 = vmul.f32 %v2270_v0, %v935_v6  ;;  %v1280_v18 = vadd.f32 %v1248_v3, %v1212_v21 }
 0x173   : > { %v1633_v36 = vadd.f32 %v2280_v9, %v1599_v25  ;;  %v1634_v16 = vadd.f32 %v2280_v9, %v1600_v19  ;;  %v1382_v8 = vmul.f32 %v2256_v55, %v823_v53  ;;  %v2972_v28 = vadd.f32 %v1115_v48, %v1079_v29 }
 0x174   : > { %v2970_v20 = vadd.f32 %v1114_v35, %v1078_v42  ;;  %v1281_v58 = vadd.f32 %v2867_v10, %v1213_v59  ;;  %v1383_v63 = vmul.f32 %v2256_v55, %v773_v43  ;;  %v2978_v22 = vadd.f32 %v1316_v33, %v1280_v18  ;;  %v2990_v10 = vld [vmem:[%s3436_s2] ss:$0 sm:$0xff]  ;;  %v3490_v43 = vld [vmem:[#allocation24_spill] sm:$0xff] }
 0x175   : > { %1665 = vst [vmem:[%s2528_s9 + $0x30] sm:$0xff] %v1633_v36  ;;  %1666 = vst [vmem:[%s2528_s9 + $0x38] sm:$0xff] %v1634_v16  ;;  %v1414_v47 = vadd.f32 %v1382_v8, %v2840_v32  ;;  %v1450_v26 = vmul.f32 %v2258_v56, %v2829_v17  ;;  %v1517_v12 = vmul.f32 %v2260_v57, %v884_v11  ;;  %v3492_v11 = vld [vmem:[#allocation27_spill] sm:$0xff] }
 0x176   : > { %v2984_v27 = vadd.f32 %v1317_v45, %v1281_v58  ;;  %v1415_v3 = vadd.f32 %v1383_v63, %v2846_v23  ;;  %v611_v52 = vadd.f32 %v2990_v10, %v3490_v43  ;;  %v2996_v32 = vadd.f32 %v2990_v10, %v3491_v46 }
 0x177   : > { %v1481_v53 = vadd.f32 %v1450_v26, %v1414_v47  ;;  %v1518_v17 = vmul.f32 %v2260_v57, %v935_v6  ;;  %v606_v40 = vadd.f32 %v2990_v10, %v3492_v11  ;;  %v3003_v23 = vadd.f32 %v2990_v10, %v3493_v1 }
 0x178   : > { %v1482_v51 = vadd.f32 %v2873_v2, %v1415_v3  ;;  %v749_v35 = vrot.slane %v611_v52, 7  ;;  %v860_v38 = vrot.slane %v611_v52, 1  ;;  %v3008_v4 = vadd.f32 %v2990_v10, %v3494_v41 }
 0x179   : > { %v1549_v61 = vadd.f32 %v1517_v12, %v1481_v53  ;;  %v1033_v62 = vmul.f32 %v2221_v39, %v611_v52  ;;  %v1235_v6 = vmul.f32 %v2254_v54, %v611_v52  ;;  %v1437_v48 = vmul.f32 %v2258_v56, %v611_v52 }
 0x17a   : > { %v1550_v31 = vadd.f32 %v1518_v17, %v1482_v51  ;;  %v757_v25 = vrot.slane %v2996_v32, 7  ;;  %v868_v19 = vrot.slane %v2996_v32, 1  ;;  %v3017_v2 = vmul.f32 %v2221_v39, %v2996_v32 }
 0x17b   : > { %v1581_v21 = vmax.f32 %v1549_v61, 0.0  ;;  %v3021_v33 = vmul.f32 %v2254_v54, %v2996_v32  ;;  %v733_v42 = vrot.slane %v606_v40, 7  ;;  %v844_v29 = vrot.slane %v606_v40, 1 }
 0x17c   : > { %v1582_v59 = vmax.f32 %v1550_v31, 0.0  ;;  %v1032_v45 = vmul.f32 %v2221_v39, %v606_v40  ;;  %v1234_v36 = vmul.f32 %v2254_v54, %v606_v40  ;;  %v1436_v16 = vmul.f32 %v2258_v56, %v606_v40 }
 0x17d   : > { %v1615_v18 = vmul.f32 %v2276_v5, %v1581_v21  ;;  %v766_v8 = vsel %vm760_vm3, %v733_v42, %v749_v35  ;;  %v782_v58 = vsel %vm760_vm3, %v749_v35, %v733_v42  ;;  %v877_v63 = vsel %vm871_vm4, %v844_v29, %v860_v38 }
 0x17e   : > { %v1616_v47 = vmul.f32 %v2276_v5, %v1582_v59  ;;  %v809_v26 = vsel %vm722_vm2, %v782_v58, 0.0  ;;  %v893_v12 = vsel %vm871_vm4, %v860_v38, %v844_v29  ;;  %v966_v3 = vmul.f32 %v2218_v37, %v766_v8 }
 0x17f   : > { %v1649_v43 = vadd.f32 %v2280_v9, %v1615_v18  ;;  %v921_v52 = vsel %vm836_vm5, %v893_v12, 0.0  ;;  %v965_v46 = vmul.f32 %v2218_v37, %v809_v26  ;;  %v1100_v53 = vmul.f32 %v2231_v44, %v877_v63 }
 0x180   : > { %v1650_v17 = vadd.f32 %v2280_v9, %v1616_v47  ;;  %v998_v11 = vadd.f32 %v2954_v14, %v966_v3  ;;  %v1101_v40 = vmul.f32 %v2231_v44, %v921_v52  ;;  %v1166_v1 = vmul.f32 %v2265_v60, %v809_v26 }
 0x181   : > { %1681 = vst [vmem:[%s2528_s9 + $0xb0] sm:$0xff] %v1649_v43  ;;  %v997_v51 = vadd.f32 %v2954_v14, %v965_v46  ;;  %v1167_v35 = vmul.f32 %v2265_v60, %v766_v8  ;;  %v1302_v38 = vmul.f32 %v2270_v0, %v877_v63  ;;  %v1303_v41 = vmul.f32 %v2270_v0, %v921_v52 }
 0x182   : > { %1682 = vst [vmem:[%s2528_s9 + $0xb8] sm:$0xff] %v1650_v17  ;;  %v1065_v61 = vadd.f32 %v1033_v62, %v998_v11  ;;  %v1198_v31 = vadd.f32 %v1166_v1, %v2913_v13  ;;  %v1368_v21 = vmul.f32 %v2256_v55, %v809_v26  ;;  %v1369_v42 = vmul.f32 %v2256_v55, %v766_v8 }
 0x183   : > { %v1064_v29 = vadd.f32 %v1032_v45, %v997_v51  ;;  %v1199_v59 = vadd.f32 %v1167_v35, %v2915_v24  ;;  %v1503_v18 = vmul.f32 %v2260_v57, %v877_v63  ;;  %v1504_v58 = vmul.f32 %v2260_v57, %v921_v52 }
 0x184   : > { %v3060_v47 = vadd.f32 %v1101_v40, %v1065_v61  ;;  %v1266_v12 = vadd.f32 %v1234_v36, %v1198_v31  ;;  %v1400_v3 = vadd.f32 %v1368_v21, %v2919_v30  ;;  %v1401_v62 = vadd.f32 %v1369_v42, %v2921_v7 }
 0x185   : > { %v3064_v43 = vadd.f32 %v1100_v53, %v1064_v29  ;;  %v1267_v13 = vadd.f32 %v1235_v6, %v1199_v59  ;;  %v741_v26 = vrot.slane %v3003_v23, 7  ;;  %v852_v45 = vrot.slane %v3003_v23, 1 }
 0x186   : > { %v3068_v8 = vadd.f32 %v1302_v38, %v1266_v12  ;;  %v1467_v24 = vadd.f32 %v1436_v16, %v1400_v3  ;;  %v1468_v63 = vadd.f32 %v1437_v48, %v1401_v62  ;;  %v1048_v52 = vmul.f32 %v2221_v39, %v3003_v23 }
 0x187   : > { %v3072_v46 = vadd.f32 %v1303_v41, %v1267_v13  ;;  %v774_v30 = vsel %vm760_vm3, %v741_v26, %v757_v25  ;;  %v790_v7 = vsel %vm760_vm3, %v757_v25, %v741_v26  ;;  %v885_v6 = vsel %vm871_vm4, %v852_v45, %v868_v19 }
 0x188   : > { %v1535_v36 = vadd.f32 %v1503_v18, %v1467_v24  ;;  %v1536_v53 = vadd.f32 %v1504_v58, %v1468_v63  ;;  %v825_v16 = vsel %vm722_vm2, %v790_v7, 0.0  ;;  %v901_v48 = vsel %vm871_vm4, %v868_v19, %v852_v45 }
 0x189   : > { %v937_v17 = vsel %vm836_vm5, %v901_v48, 0.0  ;;  %v981_v11 = vmul.f32 %v2218_v37, %v825_v16  ;;  %v982_v40 = vmul.f32 %v2218_v37, %v774_v30  ;;  %v1116_v25 = vmul.f32 %v2231_v44, %v885_v6 }
 0x18a   : > { %v1567_v1 = vmax.f32 %v1535_v36, 0.0  ;;  %v1568_v51 = vmax.f32 %v1536_v53, 0.0  ;;  %v1117_v35 = vmul.f32 %v2231_v44, %v937_v17  ;;  %v1182_v38 = vmul.f32 %v2265_v60, %v825_v16 }
 0x18b   : > { %v1013_v41 = vadd.f32 %v2954_v14, %v981_v11  ;;  %v1014_v61 = vadd.f32 %v2954_v14, %v982_v40  ;;  %v1183_v19 = vmul.f32 %v2265_v60, %v774_v30  ;;  %v1250_v31 = vmul.f32 %v2254_v54, %v3003_v23 }
 0x18c   : > { %v1601_v21 = vmul.f32 %v2276_v5, %v1567_v1  ;;  %v1602_v42 = vmul.f32 %v2276_v5, %v1568_v51  ;;  %v1214_v29 = vadd.f32 %v1182_v38, %v2970_v20  ;;  %v1318_v59 = vmul.f32 %v2270_v0, %v885_v6 }
 0x18d   : > { %v1080_v18 = vadd.f32 %v1048_v52, %v1013_v41  ;;  %v1081_v58 = vadd.f32 %v3017_v2, %v1014_v61  ;;  %v1215_v12 = vadd.f32 %v1183_v19, %v2972_v28  ;;  %v1319_v3 = vmul.f32 %v2270_v0, %v937_v17 }
 0x18e   : > { %v1635_v62 = vadd.f32 %v2280_v9, %v1601_v21  ;;  %v1636_v13 = vadd.f32 %v2280_v9, %v1602_v42  ;;  %v1282_v26 = vadd.f32 %v1250_v31, %v1214_v29  ;;  %v1384_v45 = vmul.f32 %v2256_v55, %v825_v16  ;;  %v3498_v21 = vld [vmem:[#allocation39_spill] sm:$0xff] }
 0x18f   : > { %v3106_v24 = vadd.f32 %v1116_v25, %v1080_v18  ;;  %v3108_v20 = vadd.f32 %v1117_v35, %v1081_v58  ;;  %v1283_v63 = vadd.f32 %v3021_v33, %v1215_v12  ;;  %v1385_v52 = vmul.f32 %v2256_v55, %v774_v30  ;;  %v3495_v25 = vld [vmem:[#allocation30_spill] sm:$0xff]  ;;  %v3497_v35 = vld [vmem:[#allocation32_spill] sm:$0xff] }
 0x190   : > { %v1453_v28 = vmul.f32 %v2258_v56, %v2996_v32  ;;  %1667 = vst [vmem:[%s2528_s9 + $0x40] sm:$0xff] %v1635_v62  ;;  %1668 = vst [vmem:[%s2528_s9 + $0x48] sm:$0xff] %v1636_v13  ;;  %v3116_v2 = vadd.f32 %v1318_v59, %v1282_v26  ;;  %v1416_v7 = vadd.f32 %v1384_v45, %v2978_v22  ;;  %v750_v32 = vrot.slane %v3008_v4, 7 }
 0x191   : > { %v1452_v36 = vmul.f32 %v2258_v56, %v3003_v23  ;;  %v3121_v53 = vadd.f32 %v1319_v3, %v1283_v63  ;;  %v1417_v16 = vadd.f32 %v1385_v52, %v2984_v27  ;;  %v1519_v33 = vmul.f32 %v2260_v57, %v885_v6  ;;  %v3496_v27 = vld [vmem:[#allocation31_spill] sm:$0xff] }
 0x192   : > { %v1520_v30 = vmul.f32 %v2260_v57, %v937_v17  ;;  %v861_v11 = vrot.slane %v3008_v4, 1  ;;  %v1035_v40 = vmul.f32 %v2221_v39, %v3008_v4  ;;  %v1237_v23 = vmul.f32 %v2254_v54, %v3008_v4 }
 0x193   : > { %v1483_v48 = vadd.f32 %v1452_v36, %v1416_v7  ;;  %v1484_v22 = vadd.f32 %v1453_v28, %v1417_v16  ;;  %v3134_v1 = vadd.f32 %v2990_v10, %v3495_v25  ;;  %v616_v6 = vadd.f32 %v2990_v10, %v3496_v27 }
 0x194   : > { %v1439_v51 = vmul.f32 %v2258_v56, %v3008_v4  ;;  %v3142_v38 = vadd.f32 %v2990_v10, %v3497_v35  ;;  %v3146_v41 = vadd.f32 %v2990_v10, %v2546_v15  ;;  %v3152_v42 = vadd.f32 %v2990_v10, %v3498_v21 }
 0x195   : > { %v1551_v17 = vadd.f32 %v1519_v33, %v1483_v48  ;;  %v1552_v61 = vadd.f32 %v1520_v30, %v1484_v22  ;;  %v758_v19 = vrot.slane %v3134_v1, 7  ;;  %v869_v31 = vrot.slane %v3134_v1, 1 }
 0x196   : > { %v3156_v4 = vmul.f32 %v2221_v39, %v3134_v1  ;;  %v3160_v59 = vmul.f32 %v2254_v54, %v3134_v1  ;;  %v734_v15 = vrot.slane %v616_v6, 7  ;;  %v845_v58 = vrot.slane %v616_v6, 1 }
 0x197   : > { %v1583_v29 = vmax.f32 %v1551_v17, 0.0  ;;  %v1584_v18 = vmax.f32 %v1552_v61, 0.0  ;;  %v1034_v12 = vmul.f32 %v2221_v39, %v616_v6  ;;  %v1236_v3 = vmul.f32 %v2254_v54, %v616_v6 }
 0x198   : > { %v767_v13 = vsel %vm760_vm3, %v734_v15, %v750_v32  ;;  %v783_v26 = vsel %vm760_vm3, %v750_v32, %v734_v15  ;;  %v1438_v45 = vmul.f32 %v2258_v56, %v616_v6  ;;  %v878_v28 = vsel %vm871_vm4, %v845_v58, %v861_v11 }
 0x199   : > { %v1617_v62 = vmul.f32 %v2276_v5, %v1583_v29  ;;  %v1618_v63 = vmul.f32 %v2276_v5, %v1584_v18  ;;  %v811_v52 = vsel %vm722_vm2, %v783_v26, 0.0  ;;  %v894_v7 = vsel %vm871_vm4, %v861_v11, %v845_v58 }
 0x19a   : > { %v923_v16 = vsel %vm836_vm5, %v894_v7, 0.0  ;;  %v967_v33 = vmul.f32 %v2218_v37, %v811_v52  ;;  %v968_v30 = vmul.f32 %v2218_v37, %v767_v13  ;;  %v1102_v32 = vmul.f32 %v2231_v44, %v878_v28 }
 0x19b   : > { %v1651_v36 = vadd.f32 %v2280_v9, %v1617_v62  ;;  %v1652_v48 = vadd.f32 %v2280_v9, %v1618_v63  ;;  %v1103_v22 = vmul.f32 %v2231_v44, %v923_v16  ;;  %v1168_v25 = vmul.f32 %v2265_v60, %v811_v52 }
 0x19c   : > { %v999_v11 = vadd.f32 %v2954_v14, %v967_v33  ;;  %v1000_v27 = vadd.f32 %v2954_v14, %v968_v30  ;;  %v1169_v6 = vmul.f32 %v2265_v60, %v767_v13  ;;  %v1304_v17 = vmul.f32 %v2270_v0, %v878_v28 }
 0x19d   : > { %1683 = vst [vmem:[%s2528_s9 + $0xc0] sm:$0xff] %v1651_v36  ;;  %1684 = vst [vmem:[%s2528_s9 + $0xc8] sm:$0xff] %v1652_v48  ;;  %v1200_v35 = vadd.f32 %v1168_v25, %v3064_v43  ;;  %v1305_v61 = vmul.f32 %v2270_v0, %v923_v16  ;;  %v1370_v21 = vmul.f32 %v2256_v55, %v811_v52 }
 0x19e   : > { %v1371_v29 = vmul.f32 %v2256_v55, %v767_v13  ;;  %v1066_v15 = vadd.f32 %v1034_v12, %v999_v11  ;;  %v1067_v18 = vadd.f32 %v1035_v40, %v1000_v27  ;;  %v1201_v58 = vadd.f32 %v1169_v6, %v3060_v47 }
 0x19f   : > { %v1505_v62 = vmul.f32 %v2260_v57, %v878_v28  ;;  %v1268_v26 = vadd.f32 %v1236_v3, %v1200_v35  ;;  %v1402_v63 = vadd.f32 %v1370_v21, %v3068_v8  ;;  %v1506_v36 = vmul.f32 %v2260_v57, %v923_v16 }
 0x1a0   : > { %v1403_v7 = vadd.f32 %v1371_v29, %v3072_v46  ;;  %v3201_v43 = vadd.f32 %v1102_v32, %v1066_v15  ;;  %v3203_v33 = vadd.f32 %v1103_v22, %v1067_v18  ;;  %v1269_v52 = vadd.f32 %v1237_v23, %v1201_v58 }
 0x1a1   : > { %v742_v13 = vrot.slane %v3142_v38, 7  ;;  %v3206_v12 = vadd.f32 %v1304_v17, %v1268_v26  ;;  %v1469_v40 = vadd.f32 %v1438_v45, %v1402_v63  ;;  %v853_v28 = vrot.slane %v3142_v38, 1 }
 0x1a2   : > { %v1470_v47 = vadd.f32 %v1439_v51, %v1403_v7  ;;  %v1455_v8 = vmul.f32 %v2258_v56, %v3134_v1  ;;  %v3211_v3 = vadd.f32 %v1305_v61, %v1269_v52  ;;  %v1050_v11 = vmul.f32 %v2221_v39, %v3142_v38 }
 0x1a3   : > { %v775_v46 = vsel %vm760_vm3, %v742_v13, %v758_v19  ;;  %v791_v16 = vsel %vm760_vm3, %v758_v19, %v742_v13  ;;  %v1537_v23 = vadd.f32 %v1505_v62, %v1469_v40  ;;  %v3221_v51 = vsel %vm871_vm4, %v853_v28, %v869_v31 }
 0x1a4   : > { %v1538_v30 = vadd.f32 %v1506_v36, %v1470_v47  ;;  %v827_v48 = vsel %vm722_vm2, %v791_v16, 0.0  ;;  %v902_v1 = vsel %vm871_vm4, %v869_v31, %v853_v28  ;;  %v984_v32 = vmul.f32 %v2218_v37, %v775_v46 }
 0x1a5   : > { %v983_v45 = vmul.f32 %v2218_v37, %v827_v48  ;;  %v1184_v22 = vmul.f32 %v2265_v60, %v827_v48  ;;  %v1569_v25 = vmax.f32 %v1537_v23, 0.0  ;;  %v1185_v27 = vmul.f32 %v2265_v60, %v775_v46 }
 0x1a6   : > { %v1570_v19 = vmax.f32 %v1538_v30, 0.0  ;;  %v3233_v6 = vsel %vm836_vm5, %v902_v1, 0.0  ;;  %v1252_v35 = vmul.f32 %v2254_v54, %v3142_v38  ;;  %v1386_v15 = vmul.f32 %v2256_v55, %v827_v48 }
 0x1a7   : > { %v1015_v17 = vadd.f32 %v2954_v14, %v983_v45  ;;  %v1216_v31 = vadd.f32 %v1184_v22, %v3106_v24  ;;  %v1603_v61 = vmul.f32 %v2276_v5, %v1569_v25  ;;  %v3242_v29 = vadd.f32 %v1185_v27, %v3108_v20 }
 0x1a8   : > { %v1604_v21 = vmul.f32 %v2276_v5, %v1570_v19  ;;  %v3246_v18 = vadd.f32 %v2954_v14, %v984_v32  ;;  %v1387_v62 = vmul.f32 %v2256_v55, %v775_v46  ;;  %v1418_v7 = vadd.f32 %v1386_v15, %v3116_v2 }
 0x1a9   : > { %v3248_v58 = vadd.f32 %v1050_v11, %v1015_v17  ;;  %v3250_v24 = vadd.f32 %v1252_v35, %v1216_v31  ;;  %v1637_v26 = vadd.f32 %v2280_v9, %v1603_v61  ;;  %v1454_v20 = vmul.f32 %v2258_v56, %v3142_v38  ;;  %v3499_v31 = vld [vmem:[#allocation40_spill] sm:$0xff] }
 0x1aa   : > { %v1638_v63 = vadd.f32 %v2280_v9, %v1604_v21  ;;  %v1419_v36 = vadd.f32 %v1387_v62, %v3121_v53  ;;  %v1521_v52 = vmul.f32 %v2260_v57, %v3221_v51  ;;  %v751_v13 = vrot.slane %v3146_v41, 7 }
 0x1ab   : > { %v862_v40 = vrot.slane %v3146_v41, 1  ;;  %1669 = vst [vmem:[%s2528_s9 + $0x50] sm:$0xff] %v1637_v26  ;;  %v1485_v47 = vadd.f32 %v1454_v20, %v1418_v7  ;;  %v1522_v28 = vmul.f32 %v2260_v57, %v3233_v6  ;;  %v1037_v2 = vmul.f32 %v2221_v39, %v3146_v41 }
 0x1ac   : > { %1670 = vst [vmem:[%s2528_s9 + $0x58] sm:$0xff] %v1638_v63  ;;  %v1239_v38 = vmul.f32 %v2254_v54, %v3146_v41  ;;  %v1486_v53 = vadd.f32 %v1455_v8, %v1419_v36  ;;  %v1441_v46 = vmul.f32 %v2258_v56, %v3146_v41  ;;  %v735_v16 = vrot.slane %v3152_v42, 7 }
 0x1ad   : > { %v846_v23 = vrot.slane %v3152_v42, 1  ;;  %v1553_v30 = vadd.f32 %v1521_v52, %v1485_v47  ;;  %v1036_v48 = vmul.f32 %v2221_v39, %v3152_v42  ;;  %v1238_v1 = vmul.f32 %v2254_v54, %v3152_v42 }
 0x1ae   : > { %v1440_v45 = vmul.f32 %v2258_v56, %v3152_v42  ;;  %v1554_v32 = vadd.f32 %v1522_v28, %v1486_v53  ;;  %v768_v8 = vsel %vm760_vm3, %v735_v16, %v751_v13  ;;  %v784_v41 = vsel %vm760_vm3, %v751_v13, %v735_v16 }
 0x1af   : > { %v879_v22 = vsel %vm871_vm4, %v846_v23, %v862_v40  ;;  %v1585_v25 = vmax.f32 %v1553_v30, 0.0  ;;  %v813_v39 = vsel %vm722_vm2, %v784_v41, 0.0  ;;  %v895_v19 = vsel %vm871_vm4, %v862_v40, %v846_v23 }
 0x1b0   : > { %v970_v11 = vmul.f32 %v2218_v37, %v768_v8  ;;  %v1586_v42 = vmax.f32 %v1554_v32, 0.0  ;;  %v925_v27 = vsel %vm836_vm5, %v895_v19, 0.0  ;;  %v969_v17 = vmul.f32 %v2218_v37, %v813_v39 }
 0x1b1   : > { %v3297_v35 = vadd.f32 %v2990_v10, %v3499_v31  ;;  %v1619_v61 = vmul.f32 %v2276_v5, %v1585_v25  ;;  %v1104_v15 = vmul.f32 %v2231_v44, %v879_v22  ;;  %v1170_v62 = vmul.f32 %v2265_v60, %v813_v39  ;;  %v3500_v25 = vld [vmem:[#allocation14_spill] sm:$0xff]  ;;  %v3502_v31 = vld [vmem:[#allocation5_spill] sm:$0xff] }
 0x1b2   : > { %v1002_v21 = vadd.f32 %v2954_v14, %v970_v11  ;;  %v1620_v26 = vmul.f32 %v2276_v5, %v1586_v42  ;;  %v1001_v63 = vadd.f32 %v2954_v14, %v969_v17  ;;  %v1105_v37 = vmul.f32 %v2231_v44, %v925_v27  ;;  %v3501_v11 = vld [vmem:[#allocation11_spill] sm:$0xff] }
 0x1b3   : > { %v1171_v7 = vmul.f32 %v2265_v60, %v768_v8  ;;  %v1653_v20 = vadd.f32 %v2280_v9, %v1619_v61  ;;  %v1202_v52 = vadd.f32 %v1170_v62, %v3201_v43  ;;  %v1306_v13 = vmul.f32 %v2270_v0, %v879_v22 }
 0x1b4   : > { %v1069_v36 = vadd.f32 %v1037_v2, %v1002_v21  ;;  %v1654_v40 = vadd.f32 %v2280_v9, %v1620_v26  ;;  %v1068_v47 = vadd.f32 %v1036_v48, %v1001_v63  ;;  %v1372_v53 = vmul.f32 %v2256_v55, %v813_v39  ;;  %v3505_v26 = vld [vmem:[#allocation21_spill] sm:$0xff] }
 0x1b5   : > { %v1203_v28 = vadd.f32 %v1171_v7, %v3203_v33  ;;  %1685 = vst [vmem:[%s2528_s9 + $0xd0] sm:$0xff] %v1653_v20  ;;  %v1270_v16 = vadd.f32 %v1238_v1, %v1202_v52  ;;  %v1307_v23 = vmul.f32 %v2270_v0, %v925_v27  ;;  %v1373_v30 = vmul.f32 %v2256_v55, %v768_v8  ;;  %v3507_v7 = vld [vmem:[#allocation22_spill] sm:$0xff]  ;;  %v3508_v52 = vld [vmem:[#allocation41_spill] sm:$0xff] }
 0x1b6   : > { %v1137_v14 = vadd.f32 %v1105_v37, %v1069_v36  ;;  %1686 = vst [vmem:[%s2528_s9 + $0xd8] sm:$0xff] %v1654_v40  ;;  %v1136_v2 = vadd.f32 %v1104_v15, %v1068_v47  ;;  %v1404_v43 = vadd.f32 %v1372_v53, %v3206_v12  ;;  %v1507_v41 = vmul.f32 %v2260_v57, %v879_v22  ;;  %v3504_v15 = vld [vmem:[#allocation15_spill] sm:$0xff]  ;;  %v3506_v37 = vld [vmem:[#allocation17_spill] sm:$0xff]  ;;  %v3510_v47 = vld [vmem:[#allocation6_spill] sm:$0xff] }
 0x1b7   : > { %v1271_v32 = vadd.f32 %v1239_v38, %v1203_v28  ;;  %v1338_v19 = vadd.f32 %v1306_v13, %v1270_v16  ;;  %v1405_v33 = vadd.f32 %v1373_v30, %v3211_v3  ;;  %v1508_v39 = vmul.f32 %v2260_v57, %v925_v27  ;;  %v3503_v38 = vld [vmem:[#allocation20_spill] sm:$0xff]  ;;  %v3511_v16 = vld [vmem:[#allocation35_spill] sm:$0xff] }
 0x1b8   : > { %v1205_v48 = vadd.f32 %v3500_v25, %v1137_v14  ;;  %v1204_v1 = vadd.f32 %v3501_v11, %v1136_v2  ;;  %v1471_v17 = vadd.f32 %v1440_v45, %v1404_v43  ;;  %v759_v8 = vrot.slane %v3297_v35, 7  ;;  %v3512_v30 = vld [vmem:[#allocation23_spill] sm:$0xff] }
 0x1b9   : > { %v1339_v42 = vadd.f32 %v1307_v23, %v1271_v32  ;;  %v1406_v21 = vadd.f32 %v3503_v38, %v1338_v19  ;;  %v1472_v12 = vadd.f32 %v1441_v46, %v1405_v33  ;;  %v870_v22 = vrot.slane %v3297_v35, 1  ;;  %v3509_v46 = vld [vmem:[#allocation16_spill] sm:$0xff] }
 0x1ba   : > { %v1273_v61 = vadd.f32 %v3502_v31, %v1205_v48  ;;  %v1272_v62 = vadd.f32 %v3504_v15, %v1204_v1  ;;  %v1539_v3 = vadd.f32 %v1507_v41, %v1471_v17  ;;  %v3331_v27 = vmul.f32 %v2254_v54, %v3297_v35  ;;  %v3513_v41 = vld [vmem:[#allocation34_spill] sm:$0xff] }
 0x1bb   : > { %v1407_v63 = vadd.f32 %v3505_v26, %v1339_v42  ;;  %v1473_v20 = vadd.f32 %v3507_v7, %v1406_v21  ;;  %v1540_v36 = vadd.f32 %v1508_v39, %v1472_v12  ;;  %v3337_v13 = vadd.f32 %v2990_v10, %v3508_v52  ;;  %v3514_v48 = vld [vmem:[#allocation26_spill] sm:$0xff]  ;;  %v3515_v39 = vld [vmem:[#allocation33_spill] sm:$0xff]  ;;  %v3516_v42 = vld [vmem:[#allocation36_spill] sm:$0xff] }
 0x1bc   : > { %v1341_v45 = vadd.f32 %v3506_v37, %v1273_v61  ;;  %v1340_v40 = vadd.f32 %v3509_v46, %v1272_v62  ;;  %v1571_v53 = vmax.f32 %v1539_v3, 0.0  ;;  %v1083_v14 = vadd.f32 %v3156_v4, %v3246_v18  ;;  %v3517_v21 = vld [vmem:[#allocation38_spill] sm:$0xff] }
 0x1bd   : > { %v1474_v28 = vadd.f32 %v3510_v47, %v1407_v63  ;;  %v1541_v2 = vadd.f32 %v3512_v30, %v1473_v20  ;;  %v1572_v32 = vmax.f32 %v1540_v36, 0.0  ;;  %v743_v43 = vrot.slane %v3337_v13, 7  ;;  %v3518_v63 = vld [vmem:[#allocation37_spill] sm:$0xff] }
 0x1be   : > { %v1409_v23 = vadd.f32 %v3511_v16, %v1341_v45  ;;  %v1408_v25 = vadd.f32 %v3513_v41, %v1340_v40  ;;  %v1605_v19 = vmul.f32 %v2276_v5, %v1571_v53  ;;  %v854_v33 = vrot.slane %v3337_v13, 1 }
 0x1bf   : > { %v1542_v10 = vadd.f32 %v3514_v48, %v1474_v28  ;;  %v1573_v1 = vmax.f32 %v1541_v2, 0.0  ;;  %v1606_v4 = vmul.f32 %v2276_v5, %v1572_v32  ;;  %v776_v18 = vsel %vm760_vm3, %v743_v43, %v759_v8 }
 0x1c0   : > { %v1476_v11 = vadd.f32 %v3515_v39, %v1409_v23  ;;  %v1475_v17 = vadd.f32 %v3516_v42, %v1408_v25  ;;  %v1639_v61 = vadd.f32 %v2280_v9, %v1605_v19  ;;  %v792_v38 = vsel %vm760_vm3, %v759_v8, %v743_v43 }
 0x1c1   : > { %v1574_v31 = vmax.f32 %v1542_v10, 0.0  ;;  %v1607_v15 = vmul.f32 %v2276_v5, %v1573_v1  ;;  %v1640_v62 = vadd.f32 %v2280_v9, %v1606_v4  ;;  %v829_v26 = vsel %vm722_vm2, %v792_v38, 0.0 }
 0x1c2   : > { %v1544_v12 = vadd.f32 %v3517_v21, %v1476_v11  ;;  %v1543_v3 = vadd.f32 %v3518_v63, %v1475_v17  ;;  %1671 = vst [vmem:[%s2528_s9 + $0x60] sm:$0xff] %v1639_v61  ;;  %v887_v45 = vsel %vm871_vm4, %v854_v33, %v870_v22  ;;  %v903_v8 = vsel %vm871_vm4, %v870_v22, %v854_v33 }
 0x1c3   : > { %v1608_v37 = vmul.f32 %v2276_v5, %v1574_v31  ;;  %v1641_v20 = vadd.f32 %v2280_v9, %v1607_v15  ;;  %1672 = vst [vmem:[%s2528_s9 + $0x68] sm:$0xff] %v1640_v62  ;;  %v941_v49 = vsel %vm836_vm5, %v903_v8, 0.0  ;;  %v1118_v36 = vmul.f32 %v2231_v44, %v3221_v51 }
 0x1c4   : > { %v1576_v7 = vmax.f32 %v1544_v12, 0.0  ;;  %v1575_v52 = vmax.f32 %v1543_v3, 0.0  ;;  %v1119_v40 = vmul.f32 %v2231_v44, %v3233_v6  ;;  %v1186_v34 = vmul.f32 %v2265_v60, %v829_v26 }
 0x1c5   : > { %v1642_v46 = vadd.f32 %v2280_v9, %v1608_v37  ;;  %1673 = vst [vmem:[%s2528_s9 + $0x70] sm:$0xff] %v1641_v20  ;;  %v1150_v47 = vadd.f32 %v1118_v36, %v3248_v58  ;;  %v1187_v50 = vmul.f32 %v2265_v60, %v776_v18  ;;  %v1254_v28 = vmul.f32 %v2254_v54, %v3337_v13 }
 0x1c6   : > { %v1610_v22 = vmul.f32 %v2276_v5, %v1576_v7  ;;  %v1609_v53 = vmul.f32 %v2276_v5, %v1575_v52  ;;  %v1151_v16 = vadd.f32 %v1119_v40, %v1083_v14  ;;  %v1285_v44 = vadd.f32 %v3160_v59, %v3242_v29 }
 0x1c7   : > { %1674 = vst [vmem:[%s2528_s9 + $0x78] sm:$0xff] %v1642_v46  ;;  %v1320_v23 = vmul.f32 %v2270_v0, %v3221_v51  ;;  %v1218_v58 = vadd.f32 %v1186_v34, %v1150_v47  ;;  %v1321_v60 = vmul.f32 %v2270_v0, %v3233_v6  ;;  %v1322_v2 = vmul.f32 %v2270_v0, %v887_v45 }
 0x1c8   : > { %v1644_v30 = vadd.f32 %v2280_v9, %v1610_v22  ;;  %v1643_v54 = vadd.f32 %v2280_v9, %v1609_v53  ;;  %v1219_v32 = vadd.f32 %v1187_v50, %v1151_v16  ;;  %v1323_v14 = vmul.f32 %v2270_v0, %v941_v49 }
 0x1c9   : > { %v1352_v43 = vadd.f32 %v1320_v23, %v3250_v24  ;;  %v1286_v59 = vadd.f32 %v1254_v28, %v1218_v58  ;;  %v1353_v29 = vadd.f32 %v1321_v60, %v1285_v44  ;;  %v1388_v51 = vmul.f32 %v2256_v55, %v829_v26 }
 0x1ca   : > { %1676 = vst [vmem:[%s2528_s9 + $0x88] sm:$0xff] %v1644_v30  ;;  %v1389_v41 = vmul.f32 %v2256_v55, %v776_v18  ;;  %1675 = vst [vmem:[%s2528_s9 + $0x80] sm:$0xff] %v1643_v54  ;;  %v1457_v6 = vmul.f32 %v2258_v56, %v3297_v35  ;;  %v1287_v25 = vadd.f32 %v3331_v27, %v1219_v32  ;;  %v1390_v48 = vmul.f32 0.0, %v2256_v55 }
 0x1cb   : > { %v1456_v0 = vmul.f32 %v2258_v56, %v3337_v13  ;;  %v1354_v10 = vadd.f32 %v1322_v2, %v1286_v59  ;;  %v1420_v24 = vadd.f32 %v1388_v51, %v1352_v43  ;;  %v1458_v33 = vmul.f32 0.0, %v2258_v56 }
 0x1cc   : > { %v1421_v19 = vadd.f32 %v1389_v41, %v1353_v29  ;;  %v1355_v39 = vadd.f32 %v1323_v14, %v1287_v25  ;;  %v1523_v11 = vmul.f32 %v2260_v57, %v887_v45  ;;  %v1524_v1 = vmul.f32 %v2260_v57, %v941_v49 }
 0x1cd   : > { %v1422_v4 = vadd.f32 %v1390_v48, %v1354_v10  ;;  %v1487_v18 = vadd.f32 %v1456_v0, %v1420_v24  ;;  %v1525_v27 = vmul.f32 0.0, %v2260_v57 }
 0x1ce   : > { %v1488_v35 = vadd.f32 %v1457_v6, %v1421_v19  ;;  %v1423_v42 = vadd.f32 %v1390_v48, %v1355_v39 }
 0x1cf   : > { %v1489_v55 = vadd.f32 %v1458_v33, %v1422_v4  ;;  %v1555_v17 = vadd.f32 %v1523_v11, %v1487_v18 }
 0x1d0   : > { %v1556_v13 = vadd.f32 %v1524_v1, %v1488_v35  ;;  %v1490_v31 = vadd.f32 %v1458_v33, %v1423_v42 }
 0x1d1   : > { %v1557_v61 = vadd.f32 %v1525_v27, %v1489_v55  ;;  %v1587_v56 = vmax.f32 %v1555_v17, 0.0 }
 0x1d2   : > { %v1588_v38 = vmax.f32 %v1556_v13, 0.0  ;;  %v1558_v21 = vadd.f32 %v1525_v27, %v1490_v31 }
 0x1d3   : > { %v1589_v12 = vmax.f32 %v1557_v61, 0.0  ;;  %v1621_v15 = vmul.f32 %v2276_v5, %v1587_v56 }
 0x1d4   : > { %v1622_v62 = vmul.f32 %v2276_v5, %v1588_v38  ;;  %v1590_v26 = vmax.f32 %v1558_v21, 0.0 }
 0x1d5   : > { %v1623_v57 = vmul.f32 %v2276_v5, %v1589_v12  ;;  %v1655_v63 = vadd.f32 %v2280_v9, %v1621_v15 }
 0x1d6   : > { %v1656_v3 = vadd.f32 %v2280_v9, %v1622_v62  ;;  %v1624_v37 = vmul.f32 %v2276_v5, %v1590_v26 }
 0x1d7   : > { %v1657_v45 = vadd.f32 %v2280_v9, %v1623_v57  ;;  %1687 = vst [vmem:[%s2528_s9 + $0xe0] sm:$0xff] %v1655_v63 }
 0x1d8   : > { %1688 = vst [vmem:[%s2528_s9 + $0xe8] sm:$0xff] %v1656_v3  ;;  %v1658_v8 = vadd.f32 %v2280_v9, %v1624_v37 }
 0x1d9   : > { %1689 = vst [vmem:[%s2528_s9 + $0xf0] sm:$0xff] %v1657_v45 }
 0x1da   : > { %1690 = vst [vmem:[%s2528_s9 + $0xf8] sm:$0xff] %v1658_v8 }
 0x1db PF: > { %s17_s23 = sadd.s32 1, %s2053_s23   ;;  %s3519_s21 = smov %s2049_s22 }
 0x1dc   : > { %p14_p2 = scmp.ge.s32.totalorder %s17_s23, 4   ;;  %s3520_s22 = smov %s3522_s25 }
 0x1de   :  { %16 = sbr.rel (!%p14_p2) target bundleno = 2 (0x2), region = 91 }
 0x1e5   :  { %1718 = vsyncpa [#allocation3], 1 }
 0x1e6   :  { %1720 = vsyncpa [#allocation3 + $0x1], 1 }

</bundles_post_ra>
